<compile_context>
chip_gen: v7x
topology: tpu7x:2x2x1
jax: 0.10.0
libtpu: 0.0.40
codegen_flags: <defaults>
</compile_context>

<pallas_src>
import functools
from typing import NamedTuple

import jax
import jax.numpy as jnp
from jax import lax
from jax.experimental import pallas as pl
from jax.experimental.pallas import tpu as pltpu


# ---------------------------------------------------------------------------
# Planning helpers (run outside jit, all Python/static)
# ---------------------------------------------------------------------------
def _round_up(n, m):
    return ((n + m - 1) // m) * m


def _pick_tile(n, preferred, *, prefer_multi_tiles=False):
    """Largest multiple of 128 dividing n (n is a multiple of 128), <= preferred.

    With prefer_multi_tiles, prefer a tile giving an even tile count >= 2 so the
    'parallel' grid axis splits evenly across both TensorCores on v7x.
    """
    preferred = max(128, preferred)
    divisors = [t for t in range(128, n + 1, 128) if n % t == 0 and t <= preferred]
    if not divisors:
        divisors = [128]
    if prefer_multi_tiles:
        even = [t for t in divisors if (n // t) >= 2 and (n // t) % 2 == 0]
        if even:
            return max(even)
        multi = [t for t in divisors if (n // t) >= 2]
        if multi:
            return max(multi)
    return max(divisors)


def _probe_kernel(x_ref, o_ref):
    o_ref[...] = x_ref[...] + 1.0


@functools.lru_cache(maxsize=None)
def _buffered_single_supported():
    """Probe whether pipeline_mode=pl.Buffered(1) lowers on this backend.

    Single-buffering constant-index blocks halves their VMEM footprint; if the
    backend rejects the option we silently fall back to default buffering.
    """
    try:
        x = jnp.zeros((8, 128), jnp.float32)
        out = pl.pallas_call(
            _probe_kernel,
            out_shape=jax.ShapeDtypeStruct((8, 128), jnp.float32),
            grid=(2,),
            in_specs=[pl.BlockSpec((8, 128), lambda i: (0, 0),
                                   pipeline_mode=pl.Buffered(1))],
            out_specs=pl.BlockSpec((8, 128), lambda i: (0, 0)),
        )(x)
        jax.block_until_ready(out)
        return True
    except Exception:
        return False


@functools.lru_cache(maxsize=None)
def _vmem_budget_bytes():
    """Per-core VMEM budget derived from the hardware.

    ~7/8 of the reported capacity, capped at 96 MiB: ~56 MiB on v7x (64 MiB per
    TensorCore -- the resident RHS is replicated per TC, so this is per-TC
    math), ~96 MiB on v5e/v6e (128 MiB).  Conservative 64 MiB fallback if the
    query is unavailable.
    """
    try:
        cap = int(pltpu.get_tpu_info().vmem_capacity_bytes)
    except Exception:
        cap = 64 * 1024 * 1024
    return min((cap * 7) // 8, 96 * 1024 * 1024)


class _Plan(NamedTuple):
    np_pad: int            # padded node count (multiple of 128)
    tm: int                # row-tile (parallel axis)
    tk: int                # reduction-tile (arbitrary axis)
    rhs_resident: bool     # keep full (Np, D) RHS in VMEM vs. stream (tk, D)
    single_buffer_rhs: bool
    vmem_limit: int


def _make_plan(n, d):
    np_pad = _round_up(n, 128)
    budget = _vmem_budget_bytes()
    tm = _pick_tile(np_pad, 1024, prefer_multi_tiles=True)
    tk = _pick_tile(np_pad, 2048)
    single = _buffered_single_supported()
    rhs_buffers = 1 if single else 2
    # Worst-case per-kernel tile VMEM (bf16 adj double-buffered, f32 output
    # block / accumulator, bf16 residual, gamma/beta).
    tile_bytes = (2 * tm * tk * 2
                  + 2 * tm * d * 4
                  + 2 * tm * d * 2
                  + tm * d * 4
                  + 4 * d * 4)
    resident_rhs_bytes = rhs_buffers * np_pad * d * 2
    rhs_resident = (tile_bytes + resident_rhs_bytes) <= budget
    return _Plan(np_pad=np_pad, tm=tm, tk=tk, rhs_resident=rhs_resident,
                 single_buffer_rhs=single, vmem_limit=budget)


def _resident_spec(shape, index_map, single_buffer):
    """BlockSpec for a block whose index never changes across the grid."""
    if single_buffer:
        return pl.BlockSpec(shape, index_map, pipeline_mode=pl.Buffered(1))
    return pl.BlockSpec(shape, index_map)


# ---------------------------------------------------------------------------
# Kernel 1:  H = adj^T @ X   (transpose done on-chip; no adj.T in HBM)
# grid = (Np//tm, Np//tk); k (reduction over adj rows) is the last axis.
#   a_ref : (tk, tm) tile of adj at block (k, i)                 -- bf16
#   b_ref : (Np, D) VMEM-resident RHS  OR  (tk, D) streamed tile -- bf16
#   o_ref : (tm, D) output tile (bf16), resident over k
#   acc   : (tm, D) f32 scratch accumulator
# ---------------------------------------------------------------------------
def _adjT_matmul_kernel(a_ref, b_ref, o_ref, acc_ref, *, rhs_resident):
    k = pl.program_id(1)
    tk = a_ref.shape[0]

    @pl.when(k == 0)
    def _():
        acc_ref[...] = jnp.zeros_like(acc_ref)

    if rhs_resident:
        row0 = pl.multiple_of(k * tk, tk)
        b = b_ref[pl.ds(row0, tk), :]
    else:
        b = b_ref[...]
    # adj_tile^T @ b : contract dim 0 of both operands (MXU, f32 accumulate).
    acc_ref[...] += lax.dot_general(
        a_ref[...], b,
        dimension_numbers=(((0,), (0,)), ((), ())),
        preferred_element_type=jnp.float32)

    @pl.when(k == pl.num_programs(1) - 1)
    def _():
        o_ref[...] = acc_ref[...].astype(o_ref.dtype)


def pallas_adjT_matmul(adj_b, x_b, plan):
    Np, Np2 = adj_b.shape
    assert Np == Np2 == plan.np_pad
    _, D = x_b.shape
    tm, tk = plan.tm, plan.tk
    if plan.rhs_resident:
        rhs_spec = _resident_spec((Np, D), lambda i, k: (0, 0), plan.single_buffer_rhs)
    else:
        rhs_spec = pl.BlockSpec((tk, D), lambda i, k: (k, 0))
    kern = functools.partial(_adjT_matmul_kernel, rhs_resident=plan.rhs_resident)
    return pl.pallas_call(
        kern,
        out_shape=jax.ShapeDtypeStruct((Np, D), jnp.bfloat16),
        grid_spec=pltpu.PrefetchScalarGridSpec(
            num_scalar_prefetch=0,
            grid=(Np // tm, Np // tk),
            in_specs=[
                pl.BlockSpec((tk, tm), lambda i, k: (k, i)),   # adj tile, transposed access
                rhs_spec,
            ],
            out_specs=pl.BlockSpec((tm, D), lambda i, k: (i, 0)),
            scratch_shapes=[pltpu.VMEM((tm, D), jnp.float32)],
        ),
        compiler_params=pltpu.CompilerParams(
            dimension_semantics=("parallel", "arbitrary"),
            vmem_limit_bytes=plan.vmem_limit),
    )(adj_b, x_b)


# ---------------------------------------------------------------------------
# Kernel 2: out = LayerNorm(adj @ H) * gamma + beta + X
# grid = (Np//tm, Np//tk); reduction axis last.  Accumulates directly into the
# resident f32 output block; LN + affine + residual fused in the epilogue.
# ---------------------------------------------------------------------------
def _hgcn_ln_res_kernel(a_ref, h_ref, x_ref, g_ref, b_ref, o_ref, *, rhs_resident):
    k = pl.program_id(1)
    tk = a_ref.shape[1]

    @pl.when(k == 0)
    def _():
        o_ref[...] = jnp.zeros_like(o_ref)

    if rhs_resident:
        row0 = pl.multiple_of(k * tk, tk)
        h = h_ref[pl.ds(row0, tk), :]
    else:
        h = h_ref[...]
    o_ref[...] += jnp.dot(a_ref[...], h, preferred_element_type=jnp.float32)

    @pl.when(k == pl.num_programs(1) - 1)
    def _():
        y = o_ref[...]
        mean = jnp.mean(y, axis=-1, keepdims=True)
        var = jnp.mean(jnp.square(y - mean), axis=-1, keepdims=True)
        z = (y - mean) * lax.rsqrt(var + 1e-5)                  # torch LN default eps
        o_ref[...] = z * g_ref[...] + b_ref[...] + x_ref[...].astype(jnp.float32)


def pallas_hgcn_ln_residual(adj_b, h_b, x_b, gamma, beta, plan):
    Np, Np2 = adj_b.shape
    assert Np == Np2 == plan.np_pad
    _, D = h_b.shape
    tm, tk = plan.tm, plan.tk
    gamma2 = gamma.reshape(1, D).astype(jnp.float32)
    beta2 = beta.reshape(1, D).astype(jnp.float32)
    if plan.rhs_resident:
        h_spec = _resident_spec((Np, D), lambda i, k: (0, 0), plan.single_buffer_rhs)
    else:
        h_spec = pl.BlockSpec((tk, D), lambda i, k: (k, 0))
    kern = functools.partial(_hgcn_ln_res_kernel, rhs_resident=plan.rhs_resident)
    return pl.pallas_call(
        kern,
        out_shape=jax.ShapeDtypeStruct((Np, D), jnp.float32),
        grid_spec=pltpu.PrefetchScalarGridSpec(
            num_scalar_prefetch=0,
            grid=(Np // tm, Np // tk),
            in_specs=[
                pl.BlockSpec((tm, tk), lambda i, k: (i, k)),   # adj tile
                h_spec,                                        # H (resident or streamed)
                pl.BlockSpec((tm, D), lambda i, k: (i, 0)),    # residual tile (bf16)
                _resident_spec((1, D), lambda i, k: (0, 0), plan.single_buffer_rhs),
                _resident_spec((1, D), lambda i, k: (0, 0), plan.single_buffer_rhs),
            ],
            out_specs=pl.BlockSpec((tm, D), lambda i, k: (i, 0)),
        ),
        compiler_params=pltpu.CompilerParams(
            dimension_semantics=("parallel", "arbitrary"),
            vmem_limit_bytes=plan.vmem_limit),
    )(adj_b, h_b, x_b, gamma2, beta2)


# ---------------------------------------------------------------------------
# HGNNModel forward (mode='local', keep_rate=1.0, n_layers=1)
# ---------------------------------------------------------------------------
@functools.partial(jax.jit, static_argnames=("n_users", "plan"))
def _hgnn_forward_impl(user_emb, item_emb, adj, ln_gamma, ln_beta, *, n_users, plan):
    ego = jnp.concatenate([user_emb, item_emb], axis=0).astype(jnp.float32)   # [N, D]
    N, D = ego.shape

    adj_b = adj.astype(jnp.bfloat16)     # no-op if adj is already stored in bf16
    ego_b = ego.astype(jnp.bfloat16)

    # Pad rows/cols to a multiple of 128 so tiles always divide evenly
    # (padded rows/cols are zero and sliced off afterwards; no silent truncation).
    Np = plan.np_pad
    if Np != N:
        pad = Np - N
        adj_b = jnp.pad(adj_b, ((0, pad), (0, pad)))
        ego_b = jnp.pad(ego_b, ((0, pad), (0, 0)))

    # HGCNConv(act=False):  adj @ (adj^T @ ego); then fused LN + residual.
    h = pallas_adjT_matmul(adj_b, ego_b, plan)                          # [Np, D] bf16
    out = pallas_hgcn_ln_residual(adj_b, h, ego_b, ln_gamma, ln_beta, plan)  # [Np, D] f32
    out = out[:N]                                                       # drop padded rows
    return out[:n_users], out[n_users:]


def hgnn_forward_local(user_emb, item_emb, adj, ln_gamma, ln_beta, *, n_users):
    n = user_emb.shape[0] + item_emb.shape[0]
    d = user_emb.shape[1]
    plan = _make_plan(n, d)   # planning + hardware probe run outside jit (static)
    return _hgnn_forward_impl(user_emb, item_emb, adj, ln_gamma, ln_beta,
                              n_users=n_users, plan=plan)


def _xavier_uniform(key, shape):
    fan_out, fan_in = shape
    bound = (6.0 / (fan_in + fan_out)) ** 0.5
    return jax.random.uniform(key, shape, jnp.float32, -bound, bound)


if __name__ == "__main__":
    # Small shapes consistent with the module (users+items graph, hyper_dim).
    # N = 168 is deliberately NOT a multiple of 128 to exercise the padding path.
    n_users, n_items, hyper_dim = 96, 72, 128
    N = n_users + n_items

    key = jax.random.PRNGKey(0)
    k_u, k_i, k_a = jax.random.split(key, 3)

    # embedding_dict (xavier_uniform_, deterministic)
    user_emb = _xavier_uniform(k_u, (n_users, hyper_dim))
    item_emb = _xavier_uniform(k_i, (n_items, hyper_dim))

    # Synthetic symmetric-normalized dense adjacency (stand-in for data.norm_adj),
    # stored once in bf16 (it is a training-time constant).
    a_raw = (jax.random.uniform(k_a, (N, N)) < 0.05).astype(jnp.float32)
    a_raw = jnp.maximum(a_raw, a_raw.T)
    deg = jnp.maximum(a_raw.sum(axis=1), 1.0)
    d_inv_sqrt = 1.0 / jnp.sqrt(deg)
    adj = a_raw * d_inv_sqrt[:, None] * d_inv_sqrt[None, :]
    adj_b16 = adj.astype(jnp.bfloat16)

    # LayerNorm(hyper_size) params at PyTorch default init.
    ln_gamma = jnp.ones((hyper_dim,), jnp.float32)
    ln_beta = jnp.zeros((hyper_dim,), jnp.float32)

    user_out, item_out = hgnn_forward_local(
        user_emb, item_emb, adj_b16, ln_gamma, ln_beta, n_users=n_users)
    jax.block_until_ready((user_out, item_out))

    # Reference check against plain JAX with the same bf16-rounded operands.
    ego = jnp.concatenate([user_emb, item_emb], axis=0)
    adj_f = adj_b16.astype(jnp.float32)
    ego_f = ego.astype(jnp.bfloat16).astype(jnp.float32)
    h_ref = (adj_f.T @ ego_f).astype(jnp.bfloat16).astype(jnp.float32)
    y = adj_f @ h_ref
    mu = y.mean(-1, keepdims=True)
    var = ((y - mu) ** 2).mean(-1, keepdims=True)
    z = (y - mu) / jnp.sqrt(var + 1e-5) * ln_gamma + ln_beta + ego
    ref_u, ref_i = z[:n_users], z[n_users:]

    assert user_out.shape == (n_users, hyper_dim)
    assert item_out.shape == (n_items, hyper_dim)
    assert jnp.allclose(user_out, ref_u, atol=2e-2, rtol=2e-2)
    assert jnp.allclose(item_out, ref_i, atol=2e-2, rtol=2e-2)

    print("KERNEL_OK")
</pallas_src>

<mosaic_0001>
module attributes {stable_mosaic.version = 11 : i64} {
  func.func @_probe_kernel(%arg0: i32, %arg1: memref<8x128xf32, #tpu.memory_space<vmem>>, %arg2: memref<8x128xf32, #tpu.memory_space<vmem>>) attributes {dimension_semantics = [#tpu.dimension_semantics<arbitrary>], iteration_bounds = array<i64: 2>, scalar_prefetch = 0 : i64, scratch_operands = 0 : i64, tpu.core_type = #tpu.core_type<tc>, window_params = [{pipeline_mode = #tpu.pipeline_mode<synchronous>, transform_indices = @transform_0, window_bounds = array<i64: 8, 128>}, {pipeline_mode = #tpu.pipeline_mode<synchronous>, transform_indices = @transform_1, window_bounds = array<i64: 8, 128>}]} {
    %c0 = arith.constant 0 : index
    %c0_0 = arith.constant 0 : index
    %0 = vector.load %arg1[%c0, %c0_0] : memref<8x128xf32, #tpu.memory_space<vmem>>, vector<8x128xf32>
    %cst = arith.constant 1.000000e+00 : f32
    %1 = vector.broadcast %cst : f32 to vector<8x128xf32>
    %2 = arith.addf %0, %1 : vector<8x128xf32>
    %c0_1 = arith.constant 0 : index
    %c0_2 = arith.constant 0 : index
    %3 = vector.load %arg2[%c0_1, %c0_2] : memref<8x128xf32, #tpu.memory_space<vmem>>, vector<8x128xf32>
    tpu.vector_store %arg2[%c0_1, %c0_2], %2 {strides = array<i32>} : memref<8x128xf32, #tpu.memory_space<vmem>>, vector<8x128xf32>,
    return
  }
  func.func @transform_0(%arg0: i32) -> (i32, i32) {
    %c0_i32 = arith.constant 0 : i32
    %c0_i32_0 = arith.constant 0 : i32
    %c0_i32_1 = arith.constant 0 : i32
    return %c0_i32, %c0_i32_0 : i32, i32
  }
  func.func @transform_1(%arg0: i32) -> (i32, i32) {
    %c0_i32 = arith.constant 0 : i32
    %c0_i32_0 = arith.constant 0 : i32
    %c0_i32_1 = arith.constant 0 : i32
    return %c0_i32, %c0_i32_0 : i32, i32
  }
}

module attributes {stable_mosaic.version = 11 : i64} {
  func.func @_hgcn_ln_res_kernel(%arg0: i32, %arg1: i32, %arg2: memref<128x256xbf16, #tpu.memory_space<vmem>>, %arg3: memref<256x128xbf16, #tpu.memory_space<vmem>>, %arg4: memref<128x128xbf16, #tpu.memory_space<vmem>>, %arg5: memref<1x128xf32, #tpu.memory_space<vmem>>, %arg6: memref<1x128xf32, #tpu.memory_space<vmem>>, %arg7: memref<128x128xf32, #tpu.memory_space<vmem>>) attributes {dimension_semantics = [#tpu.dimension_semantics<parallel>, #tpu.dimension_semantics<arbitrary>], iteration_bounds = array<i64: 2, 1>, scalar_prefetch = 0 : i64, scratch_operands = 0 : i64, tpu.core_type = #tpu.core_type<tc>, window_params = [{transform_indices = @transform_0, window_bounds = array<i64: 128, 256>}, {pipeline_mode = #tpu.pipeline_mode<synchronous>, transform_indices = @transform_1, window_bounds = array<i64: 256, 128>}, {transform_indices = @transform_2, window_bounds = array<i64: 128, 128>}, {pipeline_mode = #tpu.pipeline_mode<synchronous>, transform_indices = @transform_3, window_bounds = array<i64: 1, 128>}, {pipeline_mode = #tpu.pipeline_mode<synchronous>, transform_indices = @transform_4, window_bounds = array<i64: 1, 128>}, {transform_indices = @transform_5, window_bounds = array<i64: 128, 128>}]} {
    %c0_i32 = arith.constant 0 : i32
    %0 = arith.cmpi eq, %arg1, %c0_i32 : i32
    %1 = arith.extui %0 : i1 to i32
    %c0_i32_0 = arith.constant 0 : i32
    %2 = arith.cmpi ne, %1, %c0_i32_0 : i32
    scf.if %2 {
      %cst_9 = arith.constant 0.000000e+00 : f32
      %15 = vector.broadcast %cst_9 : f32 to vector<128x128xf32>
      %c0_10 = arith.constant 0 : index
      %c0_11 = arith.constant 0 : index
      %16 = vector.load %arg7[%c0_10, %c0_11] : memref<128x128xf32, #tpu.memory_space<vmem>>, vector<128x128xf32>
      tpu.vector_store %arg7[%c0_10, %c0_11], %15 {strides = array<i32>} : memref<128x128xf32, #tpu.memory_space<vmem>>, vector<128x128xf32>,
    } else {
    }
    %c256_i32 = arith.constant 256 : i32
    %3 = arith.muli %arg1, %c256_i32 : i32
    %4 = tpu.assume_multiple %3, 256 : i32
    %5 = arith.index_cast %4 : i32 to index
    %c0 = arith.constant 0 : index
    %6 = vector.load %arg3[%5, %c0] : memref<256x128xbf16, #tpu.memory_space<vmem>>, vector<256x128xbf16>
    %c0_1 = arith.constant 0 : index
    %c0_2 = arith.constant 0 : index
    %7 = vector.load %arg7[%c0_1, %c0_2] : memref<128x128xf32, #tpu.memory_space<vmem>>, vector<128x128xf32>
    %c0_3 = arith.constant 0 : index
    %c0_4 = arith.constant 0 : index
    %8 = vector.load %arg2[%c0_3, %c0_4] : memref<128x256xbf16, #tpu.memory_space<vmem>>, vector<128x256xbf16>
    %cst = arith.constant dense<0.000000e+00> : vector<128x128xf32>
    %9 = tpu.matmul %8, %6, %cst {dimension_numbers = #tpu.dot_dimension_numbers<[1], [0], [0], [1], [0, 0, 1, 1], [], []>} : vector<128x256xbf16>, vector<256x128xbf16>, vector<128x128xf32> -> vector<128x128xf32>
    %10 = arith.addf %7, %9 : vector<128x128xf32>
    %c0_5 = arith.constant 0 : index
    %c0_6 = arith.constant 0 : index
    %11 = vector.load %arg7[%c0_5, %c0_6] : memref<128x128xf32, #tpu.memory_space<vmem>>, vector<128x128xf32>
    tpu.vector_store %arg7[%c0_5, %c0_6], %10 {strides = array<i32>} : memref<128x128xf32, #tpu.memory_space<vmem>>, vector<128x128xf32>,
    %c0_i32_7 = arith.constant 0 : i32
    %12 = arith.cmpi eq, %arg1, %c0_i32_7 : i32
    %13 = arith.extui %12 : i1 to i32
    %c0_i32_8 = arith.constant 0 : i32
    %14 = arith.cmpi ne, %13, %c0_i32_8 : i32
    scf.if %14 {
      %c0_9 = arith.constant 0 : index
      %c0_10 = arith.constant 0 : index
      %15 = vector.load %arg7[%c0_9, %c0_10] : memref<128x128xf32, #tpu.memory_space<vmem>>, vector<128x128xf32>
      %cst_11 = arith.constant dense<0.000000e+00> : vector<128xf32>
      %16 = vector.multi_reduction <add>, %15, %cst_11 [1] : vector<128x128xf32> to vector<128xf32>
      %17 = vector.shape_cast %16 : vector<128xf32> to vector<128x1xf32>
      %cst_12 = arith.constant 1.280000e+02 : f32
      %18 = vector.broadcast %cst_12 : f32 to vector<128x1xf32>
      %19 = arith.divf %17, %18 : vector<128x1xf32>
      %20 = vector.broadcast %19 : vector<128x1xf32> to vector<128x128xf32>
      %21 = arith.subf %15, %20 : vector<128x128xf32>
      %22 = arith.mulf %21, %21 : vector<128x128xf32>
      %cst_13 = arith.constant dense<0.000000e+00> : vector<128xf32>
      %23 = vector.multi_reduction <add>, %22, %cst_13 [1] : vector<128x128xf32> to vector<128xf32>
      %24 = vector.shape_cast %23 : vector<128xf32> to vector<128x1xf32>
      %cst_14 = arith.constant 1.280000e+02 : f32
      %25 = vector.broadcast %cst_14 : f32 to vector<128x1xf32>
      %26 = arith.divf %24, %25 : vector<128x1xf32>
      %27 = vector.broadcast %19 : vector<128x1xf32> to vector<128x128xf32>
      %28 = arith.subf %15, %27 : vector<128x128xf32>
      %cst_15 = arith.constant 9.99999974E-6 : f32
      %29 = vector.broadcast %cst_15 : f32 to vector<128x1xf32>
      %30 = arith.addf %26, %29 : vector<128x1xf32>
      %31 = math.rsqrt %30 : vector<128x1xf32>
      %32 = vector.broadcast %31 : vector<128x1xf32> to vector<128x128xf32>
      %33 = arith.mulf %28, %32 : vector<128x128xf32>
      %c0_16 = arith.constant 0 : index
      %c0_17 = arith.constant 0 : index
      %34 = vector.load %arg5[%c0_16, %c0_17] : memref<1x128xf32, #tpu.memory_space<vmem>>, vector<1x128xf32>
      %35 = vector.broadcast %34 : vector<1x128xf32> to vector<128x128xf32>
      %36 = arith.mulf %33, %35 : vector<128x128xf32>
      %c0_18 = arith.constant 0 : index
      %c0_19 = arith.constant 0 : index
      %37 = vector.load %arg6[%c0_18, %c0_19] : memref<1x128xf32, #tpu.memory_space<vmem>>, vector<1x128xf32>
      %38 = vector.broadcast %37 : vector<1x128xf32> to vector<128x128xf32>
      %39 = arith.addf %36, %38 : vector<128x128xf32>
      %c0_20 = arith.constant 0 : index
      %c0_21 = arith.constant 0 : index
      %40 = vector.load %arg4[%c0_20, %c0_21] : memref<128x128xbf16, #tpu.memory_space<vmem>>, vector<128x128xbf16>
      %41 = arith.extf %40 : vector<128x128xbf16> to vector<128x128xf32>
      %42 = arith.addf %39, %41 : vector<128x128xf32>
      %c0_22 = arith.constant 0 : index
      %c0_23 = arith.constant 0 : index
      %43 = vector.load %arg7[%c0_22, %c0_23] : memref<128x128xf32, #tpu.memory_space<vmem>>, vector<128x128xf32>
      tpu.vector_store %arg7[%c0_22, %c0_23], %42 {strides = array<i32>} : memref<128x128xf32, #tpu.memory_space<vmem>>, vector<128x128xf32>,
    } else {
    }
    return
  }
  func.func @transform_0(%arg0: i32, %arg1: i32) -> (i32, i32) {
    %c0_i32 = arith.constant 0 : i32
    return %arg0, %arg1 : i32, i32
  }
  func.func @transform_1(%arg0: i32, %arg1: i32) -> (i32, i32) {
    %c0_i32 = arith.constant 0 : i32
    %c0_i32_0 = arith.constant 0 : i32
    %c0_i32_1 = arith.constant 0 : i32
    return %c0_i32, %c0_i32_0 : i32, i32
  }
  func.func @transform_2(%arg0: i32, %arg1: i32) -> (i32, i32) {
    %c0_i32 = arith.constant 0 : i32
    %c0_i32_0 = arith.constant 0 : i32
    return %arg0, %c0_i32 : i32, i32
  }
  func.func @transform_3(%arg0: i32, %arg1: i32) -> (i32, i32) {
    %c0_i32 = arith.constant 0 : i32
    %c0_i32_0 = arith.constant 0 : i32
    %c0_i32_1 = arith.constant 0 : i32
    return %c0_i32, %c0_i32_0 : i32, i32
  }
  func.func @transform_4(%arg0: i32, %arg1: i32) -> (i32, i32) {
    %c0_i32 = arith.constant 0 : i32
    %c0_i32_0 = arith.constant 0 : i32
    %c0_i32_1 = arith.constant 0 : i32
    return %c0_i32, %c0_i32_0 : i32, i32
  }
  func.func @transform_5(%arg0: i32, %arg1: i32) -> (i32, i32) {
    %c0_i32 = arith.constant 0 : i32
    %c0_i32_0 = arith.constant 0 : i32
    return %arg0, %c0_i32 : i32, i32
  }
}

module attributes {stable_mosaic.version = 11 : i64} {
  func.func @_adjT_matmul_kernel(%arg0: i32, %arg1: i32, %arg2: memref<256x128xbf16, #tpu.memory_space<vmem>>, %arg3: memref<256x128xbf16, #tpu.memory_space<vmem>>, %arg4: memref<128x128xbf16, #tpu.memory_space<vmem>>, %arg5: memref<128x128xf32, #tpu.memory_space<vmem>>) attributes {dimension_semantics = [#tpu.dimension_semantics<parallel>, #tpu.dimension_semantics<arbitrary>], iteration_bounds = array<i64: 2, 1>, scalar_prefetch = 0 : i64, scratch_operands = 1 : i64, tpu.core_type = #tpu.core_type<tc>, window_params = [{transform_indices = @transform_0, window_bounds = array<i64: 256, 128>}, {pipeline_mode = #tpu.pipeline_mode<synchronous>, transform_indices = @transform_1, window_bounds = array<i64: 256, 128>}, {transform_indices = @transform_2, window_bounds = array<i64: 128, 128>}]} {
    %c0_i32 = arith.constant 0 : i32
    %0 = arith.cmpi eq, %arg1, %c0_i32 : i32
    %1 = arith.extui %0 : i1 to i32
    %c0_i32_0 = arith.constant 0 : i32
    %2 = arith.cmpi ne, %1, %c0_i32_0 : i32
    scf.if %2 {
      %cst_9 = arith.constant 0.000000e+00 : f32
      %15 = vector.broadcast %cst_9 : f32 to vector<128x128xf32>
      %c0_10 = arith.constant 0 : index
      %c0_11 = arith.constant 0 : index
      %16 = vector.load %arg5[%c0_10, %c0_11] : memref<128x128xf32, #tpu.memory_space<vmem>>, vector<128x128xf32>
      tpu.vector_store %arg5[%c0_10, %c0_11], %15 {strides = array<i32>} : memref<128x128xf32, #tpu.memory_space<vmem>>, vector<128x128xf32>,
    } else {
    }
    %c256_i32 = arith.constant 256 : i32
    %3 = arith.muli %arg1, %c256_i32 : i32
    %4 = tpu.assume_multiple %3, 256 : i32
    %5 = arith.index_cast %4 : i32 to index
    %c0 = arith.constant 0 : index
    %6 = vector.load %arg3[%5, %c0] : memref<256x128xbf16, #tpu.memory_space<vmem>>, vector<256x128xbf16>
    %c0_1 = arith.constant 0 : index
    %c0_2 = arith.constant 0 : index
    %7 = vector.load %arg5[%c0_1, %c0_2] : memref<128x128xf32, #tpu.memory_space<vmem>>, vector<128x128xf32>
    %c0_3 = arith.constant 0 : index
    %c0_4 = arith.constant 0 : index
    %8 = vector.load %arg2[%c0_3, %c0_4] : memref<256x128xbf16, #tpu.memory_space<vmem>>, vector<256x128xbf16>
    %cst = arith.constant dense<0.000000e+00> : vector<128x128xf32>
    %9 = tpu.matmul %8, %6, %cst {dimension_numbers = #tpu.dot_dimension_numbers<[0], [0], [1], [1], [0, 1, 1, 1], [], []>} : vector<256x128xbf16>, vector<256x128xbf16>, vector<128x128xf32> -> vector<128x128xf32>
    %10 = arith.addf %7, %9 : vector<128x128xf32>
    %c0_5 = arith.constant 0 : index
    %c0_6 = arith.constant 0 : index
    %11 = vector.load %arg5[%c0_5, %c0_6] : memref<128x128xf32, #tpu.memory_space<vmem>>, vector<128x128xf32>
    tpu.vector_store %arg5[%c0_5, %c0_6], %10 {strides = array<i32>} : memref<128x128xf32, #tpu.memory_space<vmem>>, vector<128x128xf32>,
    %c0_i32_7 = arith.constant 0 : i32
    %12 = arith.cmpi eq, %arg1, %c0_i32_7 : i32
    %13 = arith.extui %12 : i1 to i32
    %c0_i32_8 = arith.constant 0 : i32
    %14 = arith.cmpi ne, %13, %c0_i32_8 : i32
    scf.if %14 {
      %c0_9 = arith.constant 0 : index
      %c0_10 = arith.constant 0 : index
      %15 = vector.load %arg5[%c0_9, %c0_10] : memref<128x128xf32, #tpu.memory_space<vmem>>, vector<128x128xf32>
      %16 = arith.truncf %15 : vector<128x128xf32> to vector<128x128xbf16>
      %c0_11 = arith.constant 0 : index
      %c0_12 = arith.constant 0 : index
      %17 = vector.load %arg4[%c0_11, %c0_12] : memref<128x128xbf16, #tpu.memory_space<vmem>>, vector<128x128xbf16>
      tpu.vector_store %arg4[%c0_11, %c0_12], %16 {strides = array<i32>} : memref<128x128xbf16, #tpu.memory_space<vmem>>, vector<128x128xbf16>,
    } else {
    }
    return
  }
  func.func @transform_0(%arg0: i32, %arg1: i32) -> (i32, i32) {
    %c0_i32 = arith.constant 0 : i32
    return %arg1, %arg0 : i32, i32
  }
  func.func @transform_1(%arg0: i32, %arg1: i32) -> (i32, i32) {
    %c0_i32 = arith.constant 0 : i32
    %c0_i32_0 = arith.constant 0 : i32
    %c0_i32_1 = arith.constant 0 : i32
    return %c0_i32, %c0_i32_0 : i32, i32
  }
  func.func @transform_2(%arg0: i32, %arg1: i32) -> (i32, i32) {
    %c0_i32 = arith.constant 0 : i32
    %c0_i32_0 = arith.constant 0 : i32
    return %arg0, %c0_i32 : i32, i32
  }
}

</mosaic_0001>

<bundles_post_ra>
// kernel: tpu_custom_call.1
= control target key start
LH: loop header
LB: loop body
LE: loop exit
PB: predicated region body
PF: predicated region fallthrough
CT: control target
= control target key end

     0   :  { %6 = vsyncpa [#allocation3], 0  ;;  %s341_s0 = inlined_call_operand.hbm [shape: f32[8,128], index: 0, kind: input, shape index: {}]   ;;  %s342_s1 = inlined_call_operand.hbm [shape: f32[8,128], index: 1, kind: output, shape index: {}]  }
   0x1   :  { %7 = vsyncpa [#allocation4], 0  ;;  %s262_s6 = smov 0  }
   0x2 LB: > { %s145_s7 = sadd.s32 4294967295, %s248_s6   ;;  %p146_p0 = scmp.ge.s32.totalorder %s248_s6, 1  ;;  %s248_s6 = sphi %s262_s6, %s13_s6  }
   0x3   : > { %p60_p1 = scmp.lt.s32.totalorder %s248_s6, 3  ;;  %p276_p3 = scmp.eq.s32.totalorder %s145_s7, 0 }
   0x4   : > { %s250_s10 = smov [#allocation2]   ;;  %s180_s15 = scalar_lea.hbm %s341_s0, 128 }
   0x5   : > { %p270_p2 = pnand %p146_p0, %p60_p1  ;;  %s73_s11 = sshll.u32 %s250_s10, 4  ;;  %s74_s11 = int_to_ptr.vmem [resolvable:$true] %s73_s11 }
   0x6   : > { %s347_s9 = scalar_select %p276_p3, 1, 0 }
   0x7   : > { %s346_s8 = scalar_select %p270_p2, 1, 0 }
   0x8   : > { %p162_p4 = pneg %p270_p2  ;;  %p181_p6 = scmp.ne.s32.totalorder %s341_s0, %s180_s15 }
   0x9   : > { %p187_p10 = scmp.lt.u32.totalorder %s180_s15, %s341_s0 }
   0xa   : > { %p284_p5 = pnand %p276_p3, %p162_p4 }
   0xc   : > { %p182_p7 = pneg %p284_p5 }
   0xe   : > { %p183_p8 = pnand %p182_p7, %p181_p6 }
  0x10   : > { %p184_p9 = pneg %p183_p8 }
  0x12   : > { %p189_p11 = pnand %p187_p10, %p184_p9 }
  0x14   : > { %192 = shalt.err (!%p189_p11)
}
  0x15   : > { %s193_s20 = scalar_lea.vmem %s74_s11, 128  ;;  %p201_p1 = scmp.lt.s32.totalorder %s74_s11, %s74_s11 }
  0x16   : > { %p194_p12 = scmp.ne.s32.totalorder %s74_s11, %s193_s20  ;;  %p202_p4 = scmp.lt.s32.totalorder %s193_s20, %s193_s20 }
  0x18   : > { %p196_p13 = pnand %p194_p12, %p182_p7  ;;  %p203_p3 = por %p202_p4, %p201_p1 }
  0x1a   : > { %p197_p0 = pneg %p196_p13 }
  0x1c   : > { %p204_p2 = pnand %p203_p3, %p197_p0 }
  0x1e   : > { %207 = shalt.err (!%p204_p2)
}
  0x1f   : > { %165 = dma.hbm_to_vmem [thread:$0]  (!%p284_p5), %s341_s0, 128, %s74_s11, [#allocation3]  }
  0x20   : > { %p349_p6 = scmp.ne.s32.totalorder %s346_s8, 0 }
  0x21   : > { %p350_p8 = scmp.ne.s32.totalorder (!%p349_p6), %s347_s9, 0 }
  0x22   : > { %86 = sbr.rel (%p349_p6) target bundleno = 67 (0x43), region = 24 }
  0x29   : > { %239 = dma.done.wait (%p350_p8), [#allocation3], 128  }
  0x2a   : > { %241 = vsyncadd (%p350_p8), [#allocation3], 4294967168  ;;  %s251_s23 = smov [#allocation5]   ;;  %v96_v0 = vld [vmem:[#allocation2] sm:$0xff]  ;;  %p312_p2 = scmp.eq.s32.totalorder %s145_s7, 1 }
  0x2b   : > { %s106_s24 = sshll.u32 %s251_s23, 4  ;;  %v97_v1 = vadd.f32 1.0, %v96_v0  ;;  %s107_s24 = int_to_ptr.vmem [resolvable:$true] %s106_s24 }
  0x2c   : > { %s208_s26 = scalar_lea.vmem %s107_s24, 128  ;;  %p215_p9 = scmp.lt.s32.totalorder %s107_s24, %s107_s24 }
  0x2d   : > { %98 = vst [vmem:[#allocation5] sm:$0xff] %v97_v1  ;;  %p209_p3 = scmp.ne.s32.totalorder %s107_s24, %s208_s26  ;;  %p216_p10 = scmp.lt.s32.totalorder %s208_s26, %s208_s26 }
  0x2f   : > { %p210_p5 = pnand %p209_p3, %p312_p2  ;;  %p217_p11 = por %p216_p10, %p215_p9 }
  0x31   : > { %p211_p7 = pneg %p210_p5 }
  0x33   : > { %p218_p12 = pnand %p217_p11, %p211_p7 }
  0x35   : > { %221 = shalt.err (!%p218_p12)
}
  0x36   : > { %s222_s29 = scalar_lea.hbm %s342_s1, 128 }
  0x37   : > { %p223_p13 = scmp.ne.s32.totalorder %s342_s1, %s222_s29  ;;  %p228_p4 = scmp.lt.u32.totalorder %s222_s29, %s342_s1 }
  0x39   : > { %p224_p0 = pnand %p223_p13, %p312_p2 }
  0x3b   : > { %p225_p1 = pneg %p224_p0 }
  0x3d   : > { %p230_p6 = pnand %p228_p4, %p225_p1 }
  0x3f   : > { %233 = shalt.err (!%p230_p6)
}
  0x40   : > { %159 = dma.vmem_to_hbm [thread:$0]  (%p312_p2), %s107_s24, 128, %s342_s1, [#allocation4]  }
  0x41   : > { %243 = dma.done.wait (%p312_p2), [#allocation4], 128  }
  0x42   : > { %245 = vsyncadd (%p312_p2), [#allocation4], 4294967168 }
  0x43 PF: > { %s13_s6 = sadd.s32 1, %s248_s6  }
  0x44   : > { %p10_p8 = scmp.ge.s32.totalorder %s13_s6, 4  }
  0x46   :  { %12 = sbr.rel (!%p10_p8) target bundleno = 2 (0x2), region = 53 }
  0x4d   :  { %119 = vsyncpa [#allocation3], 1 }
  0x4e   :  { %121 = vsyncpa [#allocation3 + $0x1], 1 }
  0x4f   :  { %122 = vsyncpa [#allocation4], 1 }
  0x50   :  { %124 = vsyncpa [#allocation4 + $0x1], 1 }

// kernel: _hgnn_forward_impl.2
= control target key start
LH: loop header
LB: loop body
LE: loop exit
PB: predicated region body
PF: predicated region fallthrough
CT: control target
= control target key end

     0   :  { %s1291_s9 = smov 0   ;;  %s1293_s10 = smov 0   ;;  %s1500_s0 = inlined_call_operand.vmem [shape: bf16[256,256], index: 0, kind: input, shape index: {}]   ;;  %s1501_s1 = inlined_call_operand.vmem [shape: bf16[256,128], index: 1, kind: input, shape index: {}]   ;;  %s1502_s2 = inlined_call_operand.vmem [shape: bf16[256,128], index: 2, kind: output, shape index: {}]  }
   0x1   :  { %s1295_s11 = smov 0   ;;  %s1297_s12 = smov 0  }
   0x2   :  { %s1299_s13 = smov 0  }
   0x3 LB: > { %s24_s14 = sadd.s32 1, %s1270_s12  ;;  %p40_p1 = scmp.ne.s32.totalorder %s1262_s10, %s1258_s9  ;;  %s1274_s13 = sphi %s1299_s13, %s12_s13   ;;  %s1270_s12 = sphi %s1297_s12, %s1506_s12   ;;  %s1266_s11 = sphi %s1295_s11, %s1505_s11   ;;  %s1262_s10 = sphi %s1293_s10, %s1504_s10   ;;  %s1258_s9 = sphi %s1291_s9, %s1503_s9  }
   0x4   : > { %p26_p0 = scmp.ge.s32.totalorder %s24_s14, 2  ;;  %p41_p2 = scmp.eq.s32.totalorder %s1274_s13, 0 }
   0x5   : > { %s33_s16 = sadd.s32 1, %s1262_s10  ;;  %p964_p5 = scmp.ge.s32.totalorder %s1274_s13, 2 }
   0x6   : > { %s1508_s14 = smov (%p26_p0, %s24_s14), 0  ;;  %p42_p3 = por %p41_p2, %p40_p1 }
   0x7   : > { %s29_s15 = ssub.s32 %s1270_s12, %s1508_s14  ;;  %116 = sbr.rel (%p964_p5) target bundleno = 39 (0x27), region = 20 }
   0x8   : > { %p31_p4 = scmp.eq.s32.totalorder %s29_s15, 0 }
   0xa   : > { %s1326_s17 = scalar_select %p31_p4, %s1262_s10, %s33_s16  }
   0xe   : > { %119 = sbr.rel (!%p42_p3) target bundleno = 39 (0x27), region = 24  ;;  %s121_s18 = sand.u32 (%p42_p3), 1, %s1262_s10  }
   0xf   : > { %s966_s19 = sshll.u32 (%p42_p3), %s1270_s12, 2  ;;  %s965_s20 = sshll.u32 (%p42_p3), %s121_s18, 7 }
  0x10   : > { %s1334_s23 = scalar_lea.vmem (%p42_p3), %s1500_s0, %s966_s19  ;;  %s1338_s24 = scalar_lea.vmem (%p42_p3), [#allocation3], %s965_s20 }
  0x11   : > { %v144_v0 = vld [vmem:[%s1334_s23] sm:$0xf] (%p42_p3)  ;;  %v146_v1 = vld [vmem:[%s1334_s23 + $0x8] sm:$0xf] (%p42_p3)  ;;  %v148_v2 = vld [vmem:[%s1334_s23 + $0x10] sm:$0xf] (%p42_p3) }
  0x12   : > { %145 = vst [vmem:[%s1338_s24] sm:$0xf] (%p42_p3), %v144_v0  ;;  %147 = vst [vmem:[%s1338_s24 + $0x4] sm:$0xf] (%p42_p3), %v146_v1  ;;  %v150_v3 = vld [vmem:[%s1334_s23 + $0x18] sm:$0xf] (%p42_p3) }
  0x13   : > { %v152_v4 = vld [vmem:[%s1334_s23 + $0x20] sm:$0xf] (%p42_p3)  ;;  %149 = vst [vmem:[%s1338_s24 + $0x8] sm:$0xf] (%p42_p3), %v148_v2  ;;  %151 = vst [vmem:[%s1338_s24 + $0xc] sm:$0xf] (%p42_p3), %v150_v3 }
  0x14   : > { %153 = vst [vmem:[%s1338_s24 + $0x10] sm:$0xf] (%p42_p3), %v152_v4  ;;  %v154_v5 = vld [vmem:[%s1334_s23 + $0x28] sm:$0xf] (%p42_p3)  ;;  %v156_v6 = vld [vmem:[%s1334_s23 + $0x30] sm:$0xf] (%p42_p3) }
  0x15   : > { %v158_v7 = vld [vmem:[%s1334_s23 + $0x38] sm:$0xf]  ;;  %155 = vst [vmem:[%s1338_s24 + $0x14] sm:$0xf] %v154_v5  ;;  %157 = vst [vmem:[%s1338_s24 + $0x18] sm:$0xf] %v156_v6 }
  0x16   : > { %159 = vst [vmem:[%s1338_s24 + $0x1c] sm:$0xf] %v158_v7  ;;  %v160_v8 = vld [vmem:[%s1334_s23 + $0x40] sm:$0xf]  ;;  %v162_v9 = vld [vmem:[%s1334_s23 + $0x48] sm:$0xf] }
  0x17   : > { %v164_v10 = vld [vmem:[%s1334_s23 + $0x50] sm:$0xf]  ;;  %161 = vst [vmem:[%s1338_s24 + $0x20] sm:$0xf] %v160_v8  ;;  %163 = vst [vmem:[%s1338_s24 + $0x24] sm:$0xf] %v162_v9 }
  0x18   : > { %165 = vst [vmem:[%s1338_s24 + $0x28] sm:$0xf] %v164_v10  ;;  %v166_v11 = vld [vmem:[%s1334_s23 + $0x58] sm:$0xf]  ;;  %v168_v12 = vld [vmem:[%s1334_s23 + $0x60] sm:$0xf] }
  0x19   : > { %v170_v13 = vld [vmem:[%s1334_s23 + $0x68] sm:$0xf]  ;;  %167 = vst [vmem:[%s1338_s24 + $0x2c] sm:$0xf] %v166_v11  ;;  %169 = vst [vmem:[%s1338_s24 + $0x30] sm:$0xf] %v168_v12 }
  0x1a   : > { %171 = vst [vmem:[%s1338_s24 + $0x34] sm:$0xf] %v170_v13  ;;  %v172_v14 = vld [vmem:[%s1334_s23 + $0x70] sm:$0xf]  ;;  %v174_v15 = vld [vmem:[%s1334_s23 + $0x78] sm:$0xf] }
  0x1b   : > { %v176_v16 = vld [vmem:[%s1334_s23 + $0x80] sm:$0xf]  ;;  %173 = vst [vmem:[%s1338_s24 + $0x38] sm:$0xf] %v172_v14  ;;  %175 = vst [vmem:[%s1338_s24 + $0x3c] sm:$0xf] %v174_v15 }
  0x1c   : > { %177 = vst [vmem:[%s1338_s24 + $0x40] sm:$0xf] %v176_v16  ;;  %v178_v17 = vld [vmem:[%s1334_s23 + $0x88] sm:$0xf]  ;;  %v180_v18 = vld [vmem:[%s1334_s23 + $0x90] sm:$0xf] }
  0x1d   : > { %v182_v19 = vld [vmem:[%s1334_s23 + $0x98] sm:$0xf]  ;;  %179 = vst [vmem:[%s1338_s24 + $0x44] sm:$0xf] %v178_v17  ;;  %181 = vst [vmem:[%s1338_s24 + $0x48] sm:$0xf] %v180_v18 }
  0x1e   : > { %183 = vst [vmem:[%s1338_s24 + $0x4c] sm:$0xf] %v182_v19  ;;  %v184_v20 = vld [vmem:[%s1334_s23 + $0xa0] sm:$0xf]  ;;  %v186_v21 = vld [vmem:[%s1334_s23 + $0xa8] sm:$0xf] }
  0x1f   : > { %v188_v22 = vld [vmem:[%s1334_s23 + $0xb0] sm:$0xf]  ;;  %185 = vst [vmem:[%s1338_s24 + $0x50] sm:$0xf] %v184_v20  ;;  %187 = vst [vmem:[%s1338_s24 + $0x54] sm:$0xf] %v186_v21 }
  0x20   : > { %189 = vst [vmem:[%s1338_s24 + $0x58] sm:$0xf] %v188_v22  ;;  %v190_v23 = vld [vmem:[%s1334_s23 + $0xb8] sm:$0xf]  ;;  %v192_v24 = vld [vmem:[%s1334_s23 + $0xc0] sm:$0xf] }
  0x21   : > { %v194_v25 = vld [vmem:[%s1334_s23 + $0xc8] sm:$0xf]  ;;  %191 = vst [vmem:[%s1338_s24 + $0x5c] sm:$0xf] %v190_v23  ;;  %193 = vst [vmem:[%s1338_s24 + $0x60] sm:$0xf] %v192_v24 }
  0x22   : > { %195 = vst [vmem:[%s1338_s24 + $0x64] sm:$0xf] %v194_v25  ;;  %v196_v26 = vld [vmem:[%s1334_s23 + $0xd0] sm:$0xf]  ;;  %v198_v27 = vld [vmem:[%s1334_s23 + $0xd8] sm:$0xf] }
  0x23   : > { %v200_v28 = vld [vmem:[%s1334_s23 + $0xe0] sm:$0xf]  ;;  %197 = vst [vmem:[%s1338_s24 + $0x68] sm:$0xf] %v196_v26  ;;  %199 = vst [vmem:[%s1338_s24 + $0x6c] sm:$0xf] %v198_v27 }
  0x24   : > { %201 = vst [vmem:[%s1338_s24 + $0x70] sm:$0xf] %v200_v28  ;;  %v202_v29 = vld [vmem:[%s1334_s23 + $0xe8] sm:$0xf]  ;;  %v204_v30 = vld [vmem:[%s1334_s23 + $0xf0] sm:$0xf] }
  0x25   : > { %v206_v31 = vld [vmem:[%s1334_s23 + $0xf8] sm:$0xf]  ;;  %203 = vst [vmem:[%s1338_s24 + $0x74] sm:$0xf] %v202_v29  ;;  %205 = vst [vmem:[%s1338_s24 + $0x78] sm:$0xf] %v204_v30 }
  0x26   : > { %207 = vst [vmem:[%s1338_s24 + $0x7c] sm:$0xf] %v206_v31 }
  0x27 PF: > { %p967_p6 = scmp.ge.s32.totalorder %s1274_s13, 1  ;;  %p293_p7 = scmp.lt.s32.totalorder %s1274_s13, 3 }
  0x29   : > { %p294_p8 = pnand %p967_p6, %p293_p7 }
  0x2a   : > { %s300_s25 = sand.u32 (!%p294_p8), 1, %s1258_s9   ;;  %v1220_v32 = vld [vmem:[%s1501_s1 + $0x40] sm:$0xff] (!%p294_p8)   ;;  %v1222_v34 = vld [vmem:[%s1501_s1 + $0x48] sm:$0xff] (!%p294_p8)   ;;  %v1224_v48 = vld [vmem:[%s1501_s1 + $0x50] sm:$0xff] (!%p294_p8)   ;;  %s969_s15 = sshll.u32 (!%p294_p8), %s1266_s11, 4 }
  0x2b   : > { %297 = sbr.rel (%p294_p8) target bundleno = 410 (0x19a), region = 65  ;;  %s968_s28 = sshll.u32 (!%p294_p8), %s300_s25, 7  ;;  %v1221_v33 = vld [vmem:[%s1501_s1] sm:$0xff] (!%p294_p8)   ;;  %1084 = vmatprep.subr.bf16.mxu0 (!%p294_p8), %v1220_v32  ;;  %1148 = vmatprep.subr.bf16.mxu1 (!%p294_p8), %v1220_v32  ;;  %v1223_v46 = vld [vmem:[%s1501_s1 + $0x8] sm:$0xff] (!%p294_p8)   ;;  %v1225_v49 = vld [vmem:[%s1501_s1 + $0x10] sm:$0xff] (!%p294_p8)  }
  0x2c   : > { %s1414_s5 = scalar_lea.vmem (!%p294_p8), [#allocation3], %s968_s28  ;;  %1085 = vmatpush3.bf16.msra.mxu0 (!%p294_p8), %v1221_v33  ;;  %1156 = vmatpush3.bf16.msra.mxu1 (!%p294_p8), %v1221_v33  ;;  %v1226_v50 = vld [vmem:[%s1501_s1 + $0x58] sm:$0xff] (!%p294_p8)   ;;  %v1228_v54 = vld [vmem:[%s1501_s1 + $0x60] sm:$0xff] (!%p294_p8)   ;;  %v1230_v58 = vld [vmem:[%s1501_s1 + $0x68] sm:$0xff] (!%p294_p8)   ;;  %p323_p9 = scmp.lt.s32.totalorder (!%p294_p8), %s969_s15, 31 }
  0x2d   : > { %v1204_v35 = vld [vmem:[%s1414_s5 + $0x40] sm:$0xff] (!%p294_p8)   ;;  %1086 = vmatprep.subr.bf16.mxu0 (!%p294_p8), %v1222_v34  ;;  %1149 = vmatprep.subr.bf16.mxu1 (!%p294_p8), %v1222_v34  ;;  %v1206_v37 = vld [vmem:[%s1414_s5 + $0x48] sm:$0xff] (!%p294_p8)   ;;  %v1208_v39 = vld [vmem:[%s1414_s5 + $0x50] sm:$0xff] (!%p294_p8)  }
  0x2e   : > { %v1205_v36 = vld [vmem:[%s1414_s5] sm:$0xff] (!%p294_p8)   ;;  %546 = vxpose.xlu0.c.b16.start [1/8] (!%p294_p8), %v1204_v35, 128  ;;  %v1207_v38 = vld [vmem:[%s1414_s5 + $0x8] sm:$0xff] (!%p294_p8)   ;;  %v1209_v40 = vld [vmem:[%s1414_s5 + $0x10] sm:$0xff] (!%p294_p8)  }
  0x2f   : > { %530 = vxpose.xlu1.c.b16.start [1/8] (!%p294_p8), %v1205_v36, 128  ;;  %v1210_v41 = vld [vmem:[%s1414_s5 + $0x58] sm:$0xff] (!%p294_p8)   ;;  %v1212_v43 = vld [vmem:[%s1414_s5 + $0x60] sm:$0xff] (!%p294_p8)   ;;  %v1214_v45 = vld [vmem:[%s1414_s5 + $0x68] sm:$0xff] (!%p294_p8)  }
  0x30   : > { %v1211_v42 = vld [vmem:[%s1414_s5 + $0x18] sm:$0xff] (!%p294_p8)   ;;  %v1213_v44 = vld [vmem:[%s1414_s5 + $0x20] sm:$0xff] (!%p294_p8)   ;;  %v1215_v47 = vld [vmem:[%s1414_s5 + $0x28] sm:$0xff] (!%p294_p8)   ;;  %1087 = vmatpush3.bf16.msra.mxu0 (!%p294_p8), %v1223_v46  ;;  %1157 = vmatpush3.bf16.msra.mxu1 (!%p294_p8), %v1223_v46 }
  0x31   : > { %1088 = vmatprep.subr.bf16.mxu0 (!%p294_p8), %v1224_v48  ;;  %v1216_v51 = vld [vmem:[%s1414_s5 + $0x70] sm:$0xff] (!%p294_p8)   ;;  %1150 = vmatprep.subr.bf16.mxu1 (!%p294_p8), %v1224_v48  ;;  %v1227_v53 = vld [vmem:[%s1501_s1 + $0x18] sm:$0xff] (!%p294_p8)   ;;  %v1229_v57 = vld [vmem:[%s1501_s1 + $0x20] sm:$0xff] (!%p294_p8)  }
  0x32   : > { %547 = vxpose.xlu0.c.b16.cont [2/8] %v1206_v37, 128  ;;  %v1217_v52 = vld [vmem:[%s1414_s5 + $0x30] sm:$0xff]   ;;  %v1218_v55 = vld [vmem:[%s1414_s5 + $0x78] sm:$0xff]   ;;  %v1231_v59 = vld [vmem:[%s1501_s1 + $0x28] sm:$0xff]   ;;  %s1510_s15 = smov (!%p323_p9, %s969_s15), 31 }
  0x33   : > { %531 = vxpose.xlu1.c.b16.cont [2/8] %v1207_v38, 128  ;;  %v1219_v56 = vld [vmem:[%s1414_s5 + $0x38] sm:$0xff]   ;;  %v1232_v60 = vld [vmem:[%s1501_s1 + $0x70] sm:$0xff]   ;;  %s970_s16 = sshll.u32 %s1510_s15, 2 }
  0x34   : > { %1089 = vmatpush3.bf16.msra.mxu0 %v1225_v49  ;;  %1158 = vmatpush3.bf16.msra.mxu1 %v1225_v49  ;;  %v1233_v61 = vld [vmem:[%s1501_s1 + $0x30] sm:$0xff]   ;;  %v1234_v62 = vld [vmem:[%s1501_s1 + $0x78] sm:$0xff]   ;;  %s1475_s20 = scalar_lea.vmem %s1502_s2, %s970_s16 }
  0x35   : > { %1090 = vmatprep.subr.bf16.mxu0 %v1226_v50  ;;  %1151 = vmatprep.subr.bf16.mxu1 %v1226_v50  ;;  %v1235_v63 = vld [vmem:[%s1501_s1 + $0x38] sm:$0xff]  }
  0x36   : > { %548 = vxpose.xlu0.c.b16.cont [3/8] %v1208_v39, 128 }
  0x37   : > { %532 = vxpose.xlu1.c.b16.cont [3/8] %v1209_v40, 128 }
  0x38   : > { %1091 = vmatpush3.bf16.msra.mxu0 %v1227_v53  ;;  %1159 = vmatpush3.bf16.msra.mxu1 %v1227_v53 }
  0x39   : > { %1092 = vmatprep.subr.bf16.mxu0 %v1228_v54  ;;  %1152 = vmatprep.subr.bf16.mxu1 %v1228_v54 }
  0x3a   : > { %549 = vxpose.xlu0.c.b16.cont [4/8] %v1210_v41, 128 }
  0x3b   : > { %533 = vxpose.xlu1.c.b16.cont [4/8] %v1211_v42, 128 }
  0x3c   : > { %1093 = vmatpush3.bf16.msra.mxu0 %v1229_v57  ;;  %1160 = vmatpush3.bf16.msra.mxu1 %v1229_v57 }
  0x3d   : > { %1094 = vmatprep.subr.bf16.mxu0 %v1230_v58  ;;  %1153 = vmatprep.subr.bf16.mxu1 %v1230_v58 }
  0x3e   : > { %550 = vxpose.xlu0.c.b16.cont [5/8] %v1212_v43, 128 }
  0x3f   : > { %534 = vxpose.xlu1.c.b16.cont [5/8] %v1213_v44, 128 }
  0x40   : > { %1095 = vmatpush3.bf16.msra.mxu0 %v1231_v59  ;;  %1161 = vmatpush3.bf16.msra.mxu1 %v1231_v59 }
  0x41   : > { %1096 = vmatprep.subr.bf16.mxu0 %v1232_v60  ;;  %1154 = vmatprep.subr.bf16.mxu1 %v1232_v60 }
  0x42   : > { %551 = vxpose.xlu0.c.b16.cont [6/8] %v1214_v45, 128 }
  0x43   : > { %535 = vxpose.xlu1.c.b16.cont [6/8] %v1215_v47, 128 }
  0x44   : > { %1097 = vmatpush3.bf16.msra.mxu0 %v1233_v61  ;;  %1162 = vmatpush3.bf16.msra.mxu1 %v1233_v61 }
  0x45   : > { %1098 = vmatprep.subr.bf16.mxu0 %v1234_v62  ;;  %1155 = vmatprep.subr.bf16.mxu1 %v1234_v62 }
  0x46   : > { %552 = vxpose.xlu0.c.b16.cont [7/8] %v1216_v51, 128 }
  0x47   : > { %536 = vxpose.xlu1.c.b16.cont [7/8] %v1217_v52, 128 }
  0x48   : > { %1099 = vmatpush3.bf16.msra.mxu0 %v1235_v63  ;;  %1163 = vmatpush3.bf16.msra.mxu1 %v1235_v63 }
  0x4a   : > { %553 = vxpose.xlu0.c.b16.end [8/8] %v1218_v55, 128 }
  0x4b   : > { %537 = vxpose.xlu1.c.b16.end [8/8] %v1219_v56, 128 }
  0x94   : > { %v554_v0 = vpop.trf.xlu0 }
  0x95   : > { %690 = vmatprep.mubr.bf16.mxu0 %v554_v0  ;;  %v538_v1 = vpop.trf.xlu1 }
  0x96   : > { %691 = vmatmul.mubr.bf16.vlgmr.msra.gmra.mrb[0].mxu0 %v538_v1 }
  0x98   : > { %v555_v2 = vpop.trf.xlu0 }
  0x99   : > { %698 = vmatprep.mubr.bf16.mxu0 %v555_v2  ;;  %v539_v3 = vpop.trf.xlu1 }
  0x9c   : > { %v556_v4 = vpop.trf.xlu0 }
  0x9d   : > { %v540_v5 = vpop.trf.xlu1 }
  0x9e   : > { %699 = vmatmul.mubr.bf16.gmra.mrb[4].mxu0 %v539_v3 }
  0x9f   : > { %706 = vmatprep.mubr.bf16.mxu0 %v556_v4 }
  0xa0   : > { %v557_v6 = vpop.trf.xlu0 }
  0xa1   : > { %v541_v7 = vpop.trf.xlu1 }
  0xa4   : > { %v558_v8 = vpop.trf.xlu0 }
  0xa5   : > { %722 = vmatprep.mubr.bf16.mxu1 %v558_v8  ;;  %v542_v9 = vpop.trf.xlu1 }
  0xa6   : > { %707 = vmatmul.mubr.bf16.gmra.mrb[8].mxu0 %v540_v5  ;;  %723 = vmatmul.mubr.bf16.vlgmr.msra.gmra.mrb[0].mxu1 %v542_v9 }
  0xa7   : > { %714 = vmatprep.mubr.bf16.mxu0 %v557_v6 }
  0xa8   : > { %v559_v10 = vpop.trf.xlu0 }
  0xa9   : > { %730 = vmatprep.mubr.bf16.mxu1 %v559_v10  ;;  %v543_v11 = vpop.trf.xlu1 }
  0xac   : > { %v560_v12 = vpop.trf.xlu0 }
  0xad   : > { %v544_v13 = vpop.trf.xlu1 }
  0xae   : > { %715 = vmatmul.mubr.bf16.gmra.mrb[12].mxu0 %v541_v7  ;;  %731 = vmatmul.mubr.bf16.gmra.mrb[4].mxu1 %v543_v11 }
  0xaf   : > { %738 = vmatprep.mubr.bf16.mxu1 %v560_v12 }
  0xb0   : > { %v561_v14 = vpop.trf.xlu0 }
  0xb1   : > { %v545_v15 = vpop.trf.xlu1 }
  0xb6   : > { %739 = vmatmul.mubr.bf16.gmra.mrb[8].mxu1 %v544_v13 }
  0xb7   : > { %746 = vmatprep.mubr.bf16.mxu1 %v561_v14 }
  0xbe   : > { %747 = vmatmul.mubr.bf16.gmra.mrb[12].mxu1 %v545_v15 }
 0x169   : > { %v1100_v16 = vpop.f32.mrb[0].mxu0 }
 0x16a   : > { %v1101_v17 = vpop.f32.mrb[1].mxu0 }
 0x16b   : > { %v1102_v18 = vadd.f32 %v1101_v17, %v1100_v16  ;;  %v1103_v19 = vpop.f32.mrb[2].mxu0 }
 0x16c   : > { %v1104_v20 = vpop.f32.mrb[3].mxu0 }
 0x16d   : > { %v1105_v21 = vadd.f32 %v1104_v20, %v1103_v19 }
 0x16f   : > { %v1040_v22 = vpack.c.bf16 %v1105_v21, %v1102_v18 }
 0x171   : > { %1041 = vst [vmem:[%s1475_s20] sm:$0xff] %v1040_v22   ;;  %v1106_v23 = vpop.f32.mrb[4].mxu0 }
 0x172   : > { %v1107_v24 = vpop.f32.mrb[5].mxu0 }
 0x173   : > { %v1108_v25 = vadd.f32 %v1107_v24, %v1106_v23  ;;  %v1109_v26 = vpop.f32.mrb[6].mxu0 }
 0x174   : > { %v1110_v27 = vpop.f32.mrb[7].mxu0 }
 0x175   : > { %v1111_v28 = vadd.f32 %v1110_v27, %v1109_v26 }
 0x177   : > { %v1045_v29 = vpack.c.bf16 %v1111_v28, %v1108_v25 }
 0x179   : > { %1077 = vst [vmem:[%s1475_s20 + $0x8] sm:$0xff] %v1045_v29   ;;  %v1112_v30 = vpop.f32.mrb[8].mxu0  ;;  %v1124_v31 = vpop.f32.mrb[0].mxu1 }
 0x17a   : > { %v1113_v32 = vpop.f32.mrb[9].mxu0  ;;  %v1125_v33 = vpop.f32.mrb[1].mxu1 }
 0x17b   : > { %v1114_v34 = vadd.f32 %v1113_v32, %v1112_v30  ;;  %v1126_v35 = vadd.f32 %v1125_v33, %v1124_v31  ;;  %v1115_v36 = vpop.f32.mrb[10].mxu0  ;;  %v1127_v37 = vpop.f32.mrb[2].mxu1 }
 0x17c   : > { %v1116_v38 = vpop.f32.mrb[11].mxu0  ;;  %v1128_v39 = vpop.f32.mrb[3].mxu1 }
 0x17d   : > { %v1117_v40 = vadd.f32 %v1116_v38, %v1115_v36  ;;  %v1129_v41 = vadd.f32 %v1128_v39, %v1127_v37 }
 0x17f   : > { %v1050_v42 = vpack.c.bf16 %v1117_v40, %v1114_v34  ;;  %v1060_v43 = vpack.c.bf16 %v1129_v41, %v1126_v35 }
 0x181   : > { %1078 = vst [vmem:[%s1475_s20 + $0x10] sm:$0xff] %v1050_v42   ;;  %1080 = vst [vmem:[%s1475_s20 + $0x20] sm:$0xff] %v1060_v43   ;;  %v1118_v44 = vpop.f32.mrb[12].mxu0  ;;  %v1130_v45 = vpop.f32.mrb[4].mxu1 }
 0x182   : > { %v1119_v46 = vpop.f32.mrb[13].mxu0  ;;  %v1131_v47 = vpop.f32.mrb[5].mxu1 }
 0x183   : > { %v1120_v48 = vadd.f32 %v1119_v46, %v1118_v44  ;;  %v1132_v49 = vadd.f32 %v1131_v47, %v1130_v45  ;;  %v1121_v50 = vpop.f32.mrb[14].mxu0  ;;  %v1133_v51 = vpop.f32.mrb[6].mxu1 }
 0x184   : > { %v1122_v52 = vpop.f32.mrb[15].mxu0  ;;  %v1134_v53 = vpop.f32.mrb[7].mxu1 }
 0x185   : > { %v1123_v54 = vadd.f32 %v1122_v52, %v1121_v50  ;;  %v1135_v55 = vadd.f32 %v1134_v53, %v1133_v51 }
 0x187   : > { %v1055_v56 = vpack.c.bf16 %v1123_v54, %v1120_v48  ;;  %v1065_v57 = vpack.c.bf16 %v1135_v55, %v1132_v49 }
 0x189   : > { %1079 = vst [vmem:[%s1475_s20 + $0x18] sm:$0xff] %v1055_v56   ;;  %1081 = vst [vmem:[%s1475_s20 + $0x28] sm:$0xff] %v1065_v57   ;;  %v1136_v58 = vpop.f32.mrb[8].mxu1 }
 0x18a   : > { %v1137_v59 = vpop.f32.mrb[9].mxu1 }
 0x18b   : > { %v1138_v60 = vadd.f32 %v1137_v59, %v1136_v58  ;;  %v1139_v61 = vpop.f32.mrb[10].mxu1 }
 0x18c   : > { %v1140_v62 = vpop.f32.mrb[11].mxu1 }
 0x18d   : > { %v1141_v63 = vadd.f32 %v1140_v62, %v1139_v61 }
 0x18f   : > { %v1070_v0 = vpack.c.bf16 %v1141_v63, %v1138_v60 }
 0x191   : > { %1082 = vst [vmem:[%s1475_s20 + $0x30] sm:$0xff] %v1070_v0   ;;  %v1142_v1 = vpop.f32.mrb[12].mxu1 }
 0x192   : > { %v1143_v2 = vpop.f32.mrb[13].mxu1 }
 0x193   : > { %v1144_v3 = vadd.f32 %v1143_v2, %v1142_v1  ;;  %v1145_v4 = vpop.f32.mrb[14].mxu1 }
 0x194   : > { %v1146_v5 = vpop.f32.mrb[15].mxu1 }
 0x195   : > { %v1147_v6 = vadd.f32 %v1146_v5, %v1145_v4 }
 0x197   : > { %v1075_v7 = vpack.c.bf16 %v1147_v6, %v1144_v3 }
 0x199   : > { %1083 = vst [vmem:[%s1475_s20 + $0x38] sm:$0xff] %v1075_v7  }
 0x19a PF: > { %s12_s13 = sadd.s32 1, %s1274_s13   ;;  %s1503_s9 = smov %s1262_s10 }
 0x19b   : > { %p9_p10 = scmp.ge.s32.totalorder %s12_s13, 4   ;;  %s1504_s10 = smov %s1326_s17 }
 0x19c   : > { %s1505_s11 = smov %s1270_s12  ;;  %s1506_s12 = smov %s1508_s14 }
 0x19d   :  { %11 = sbr.rel (!%p9_p10) target bundleno = 3 (0x3), region = 113 }

// kernel: _hgnn_forward_impl.3
= control target key start
LH: loop header
LB: loop body
LE: loop exit
PB: predicated region body
PF: predicated region fallthrough
CT: control target
= control target key end

     0   :  { %s1386_s18 = smov 0   ;;  %s1388_s19 = smov 0   ;;  %s1718_s0 = inlined_call_operand.vmem [shape: bf16[256,256], index: 0, kind: input, shape index: {}]   ;;  %s1719_s1 = inlined_call_operand.vmem [shape: bf16[256,128], index: 1, kind: input, shape index: {}]   ;;  %s1720_s2 = inlined_call_operand.vmem [shape: bf16[256,128], index: 2, kind: input, shape index: {}]   ;;  %s1721_s3 = inlined_call_operand.vmem [shape: f32[1,128], index: 3, kind: input, shape index: {}]   ;;  %s1722_s4 = inlined_call_operand.vmem [shape: f32[1,128], index: 4, kind: input, shape index: {}]   ;;  %s1723_s5 = inlined_call_operand.vmem [shape: f32[256,128], index: 5, kind: output, shape index: {}]  }
   0x1   :  { %s1390_s20 = smov 0  }
   0x2 LB: > { %s27_s21 = sadd.s32 1, %s1350_s19  ;;  %p1071_p0 = scmp.ge.s32.totalorder %s1354_s20, 1  ;;  %s1354_s20 = sphi %s1390_s20, %s15_s20   ;;  %s1350_s19 = sphi %s1388_s19, %s1725_s19   ;;  %s1346_s18 = sphi %s1386_s18, %s1724_s18  }
   0x3   : > { %p29_p1 = scmp.ge.s32.totalorder %s27_s21, 2  ;;  %p219_p2 = scmp.lt.s32.totalorder %s1354_s20, 3 }
   0x5   : > { %s1727_s21 = smov (%p29_p1, %s27_s21), 0  ;;  %p220_p3 = pnand %p1071_p0, %p219_p2 }
   0x6   : > { %v1260_v0 = vld [vmem:[%s1719_s1 + $0x40] sm:$0xff] (!%p220_p3)   ;;  %s1072_s24 = sshll.u32 (!%p220_p3), %s1346_s18, 4  ;;  %v1262_v2 = vld [vmem:[%s1719_s1 + $0x48] sm:$0xff] (!%p220_p3)   ;;  %v1264_v4 = vld [vmem:[%s1719_s1 + $0x50] sm:$0xff] (!%p220_p3)  }
   0x7   : > { %223 = sbr.rel (%p220_p3) target bundleno = 604 (0x25c), region = 40  ;;  %v1261_v1 = vld [vmem:[%s1719_s1] sm:$0xff] (!%p220_p3)   ;;  %1155 = vmatprep.subr.bf16.mxu0 (!%p220_p3), %v1260_v0  ;;  %1219 = vmatprep.subr.bf16.mxu1 (!%p220_p3), %v1260_v0  ;;  %v1263_v3 = vld [vmem:[%s1719_s1 + $0x8] sm:$0xff] (!%p220_p3)   ;;  %p259_p4 = scmp.lt.s32.totalorder (!%p220_p3), %s1072_s24, 31  ;;  %v1265_v5 = vld [vmem:[%s1719_s1 + $0x10] sm:$0xff] (!%p220_p3)  }
   0x8   : > { %1156 = vmatpush3.bf16.msra.mxu0 (!%p220_p3), %v1261_v1  ;;  %1227 = vmatpush3.bf16.msra.mxu1 (!%p220_p3), %v1261_v1  ;;  %v1266_v6 = vld [vmem:[%s1719_s1 + $0x58] sm:$0xff] (!%p220_p3)   ;;  %v1268_v8 = vld [vmem:[%s1719_s1 + $0x60] sm:$0xff] (!%p220_p3)   ;;  %v1270_v10 = vld [vmem:[%s1719_s1 + $0x68] sm:$0xff] (!%p220_p3)  }
   0x9   : > { %1157 = vmatprep.subr.bf16.mxu0 (!%p220_p3), %v1262_v2  ;;  %1220 = vmatprep.subr.bf16.mxu1 (!%p220_p3), %v1262_v2  ;;  %v1267_v7 = vld [vmem:[%s1719_s1 + $0x18] sm:$0xff] (!%p220_p3)   ;;  %v1269_v9 = vld [vmem:[%s1719_s1 + $0x20] sm:$0xff] (!%p220_p3)   ;;  %v1271_v13 = vld [vmem:[%s1719_s1 + $0x28] sm:$0xff] (!%p220_p3)  }
   0xa   : > { %v1272_v14 = vld [vmem:[%s1719_s1 + $0x70] sm:$0xff] (!%p220_p3)   ;;  %v1274_v16 = vld [vmem:[%s1719_s1 + $0x78] sm:$0xff] (!%p220_p3)  }
   0xb   : > { %v1273_v15 = vld [vmem:[%s1719_s1 + $0x30] sm:$0xff] (!%p220_p3)   ;;  %v1275_v17 = vld [vmem:[%s1719_s1 + $0x38] sm:$0xff] (!%p220_p3)  }
   0xc   : > { %1158 = vmatpush3.bf16.msra.mxu0 (!%p220_p3), %v1263_v3  ;;  %1228 = vmatpush3.bf16.msra.mxu1 (!%p220_p3), %v1263_v3 }
   0xd   : > { %1159 = vmatprep.subr.bf16.mxu0 (!%p220_p3), %v1264_v4  ;;  %1221 = vmatprep.subr.bf16.mxu1 (!%p220_p3), %v1264_v4 }
   0xe   : > { %s1729_s24 = smov (!%p259_p4, %s1072_s24), 31 }
   0xf   : > { %s1115_s14 = sshll.u32 %s1729_s24, 3  ;;  %s1076_s13 = sshll.u32 %s1729_s24, 2 }
  0x10   : > { %1160 = vmatpush3.bf16.msra.mxu0 %v1265_v5  ;;  %1229 = vmatpush3.bf16.msra.mxu1 %v1265_v5  ;;  %s1439_s22 = scalar_lea.vmem %s1718_s0, %s1115_s14  ;;  %s1602_s17 = scalar_lea.vmem %s1720_s2, %s1076_s13 }
  0x11   : > { %1161 = vmatprep.subr.bf16.mxu0 %v1266_v6  ;;  %1222 = vmatprep.subr.bf16.mxu1 %v1266_v6  ;;  %v1278_v11 = vld [vmem:[%s1439_s22 + $0x4] ss:$8 sps:$4 sm:$0xff]   ;;  %v1276_v18 = vld [vmem:[%s1439_s22] ss:$8 sps:$4 sm:$0xff]   ;;  %v1282_v20 = vld [vmem:[%s1439_s22 + $0x14] ss:$8 sps:$4 sm:$0xff]   ;;  %s1630_s28 = scalar_lea.vmem %s1723_s5, %s1115_s14 }
  0x12   : > { %v1281_v12 = vld [vmem:[%s1439_s22 + $0x44] ss:$8 sps:$4 sm:$0xff]   ;;  %579 = vmatprep.mubr.bf16.mxu0 %v1278_v11  ;;  %v1279_v19 = vld [vmem:[%s1439_s22 + $0x40] ss:$8 sps:$4 sm:$0xff]   ;;  %v1285_v21 = vld [vmem:[%s1439_s22 + $0x54] ss:$8 sps:$4 sm:$0xff]  }
  0x13   : > { %611 = vmatprep.mubr.bf16.mxu1 %v1281_v12  ;;  %v1284_v22 = vld [vmem:[%s1439_s22 + $0x10] ss:$8 sps:$4 sm:$0xff]   ;;  %v1288_v24 = vld [vmem:[%s1439_s22 + $0x24] ss:$8 sps:$4 sm:$0xff]   ;;  %v1290_v26 = vld [vmem:[%s1439_s22 + $0x20] ss:$8 sps:$4 sm:$0xff]  }
  0x14   : > { %1162 = vmatpush3.bf16.msra.mxu0 %v1267_v7  ;;  %1230 = vmatpush3.bf16.msra.mxu1 %v1267_v7  ;;  %v1287_v23 = vld [vmem:[%s1439_s22 + $0x50] ss:$8 sps:$4 sm:$0xff]   ;;  %v1291_v25 = vld [vmem:[%s1439_s22 + $0x64] ss:$8 sps:$4 sm:$0xff]   ;;  %v1293_v27 = vld [vmem:[%s1439_s22 + $0x60] ss:$8 sps:$4 sm:$0xff]  }
  0x15   : > { %1163 = vmatprep.subr.bf16.mxu0 %v1268_v8  ;;  %1223 = vmatprep.subr.bf16.mxu1 %v1268_v8  ;;  %v1294_v28 = vld [vmem:[%s1439_s22 + $0x34] ss:$8 sps:$4 sm:$0xff]   ;;  %v1296_v30 = vld [vmem:[%s1439_s22 + $0x30] ss:$8 sps:$4 sm:$0xff]  }
  0x16   : > { %v1297_v29 = vld [vmem:[%s1439_s22 + $0x74] ss:$8 sps:$4 sm:$0xff]   ;;  %v1299_v31 = vld [vmem:[%s1439_s22 + $0x70] ss:$8 sps:$4 sm:$0xff]  }
  0x18   : > { %1164 = vmatpush3.bf16.msra.mxu0 %v1269_v9  ;;  %1231 = vmatpush3.bf16.msra.mxu1 %v1269_v9 }
  0x19   : > { %1165 = vmatprep.subr.bf16.mxu0 %v1270_v10  ;;  %1224 = vmatprep.subr.bf16.mxu1 %v1270_v10 }
  0x1c   : > { %1166 = vmatpush3.bf16.msra.mxu0 %v1271_v13  ;;  %1232 = vmatpush3.bf16.msra.mxu1 %v1271_v13 }
  0x1d   : > { %1167 = vmatprep.subr.bf16.mxu0 %v1272_v14  ;;  %1225 = vmatprep.subr.bf16.mxu1 %v1272_v14 }
  0x20   : > { %1168 = vmatpush3.bf16.msra.mxu0 %v1273_v15  ;;  %1233 = vmatpush3.bf16.msra.mxu1 %v1273_v15 }
  0x21   : > { %1169 = vmatprep.subr.bf16.mxu0 %v1274_v16  ;;  %1226 = vmatprep.subr.bf16.mxu1 %v1274_v16 }
  0x24   : > { %1170 = vmatpush3.bf16.msra.mxu0 %v1275_v17  ;;  %1234 = vmatpush3.bf16.msra.mxu1 %v1275_v17 }
  0x27   : > { %580 = vmatmul.mubr.bf16.vlgmr.msra.gmra.mrb[0].mxu0 %v1276_v18  ;;  %612 = vmatmul.mubr.bf16.vlgmr.msra.gmra.mrb[0].mxu1 %v1279_v19 }
  0x28   : > { %587 = vmatprep.mubr.bf16.mxu0 %v1282_v20  ;;  %619 = vmatprep.mubr.bf16.mxu1 %v1285_v21 }
  0x2f   : > { %588 = vmatmul.mubr.bf16.gmra.mrb[4].mxu0 %v1284_v22  ;;  %620 = vmatmul.mubr.bf16.gmra.mrb[4].mxu1 %v1287_v23 }
  0x30   : > { %595 = vmatprep.mubr.bf16.mxu0 %v1288_v24  ;;  %627 = vmatprep.mubr.bf16.mxu1 %v1291_v25 }
  0x37   : > { %596 = vmatmul.mubr.bf16.gmra.mrb[8].mxu0 %v1290_v26  ;;  %628 = vmatmul.mubr.bf16.gmra.mrb[8].mxu1 %v1293_v27 }
  0x38   : > { %603 = vmatprep.mubr.bf16.mxu0 %v1294_v28  ;;  %635 = vmatprep.mubr.bf16.mxu1 %v1297_v29 }
  0x3f   : > { %604 = vmatmul.mubr.bf16.gmra.mrb[12].mxu0 %v1296_v30  ;;  %636 = vmatmul.mubr.bf16.gmra.mrb[12].mxu1 %v1299_v31 }
  0xfa   : > { %v1171_v32 = vpop.f32.mrb[0].mxu0  ;;  %v1195_v33 = vpop.f32.mrb[0].mxu1 }
  0xfb   : > { %v1172_v34 = vpop.f32.mrb[1].mxu0  ;;  %v1196_v35 = vpop.f32.mrb[1].mxu1 }
  0xfc   : > { %v1173_v36 = vadd.f32 %v1172_v34, %v1171_v32  ;;  %v1478_v37 = vadd.f32 %v1196_v35, %v1195_v33  ;;  %v1174_v38 = vpop.f32.mrb[2].mxu0  ;;  %v1198_v39 = vpop.f32.mrb[2].mxu1 }
  0xfd   : > { %v1175_v40 = vpop.f32.mrb[3].mxu0  ;;  %v1199_v41 = vpop.f32.mrb[3].mxu1 }
  0xfe   : > { %v1480_v42 = vadd.f32 %v1175_v40, %v1174_v38  ;;  %v1482_v43 = vadd.f32 %v1199_v41, %v1198_v39  ;;  %695 = vadd.xlane.f32.xlu0 %v1173_v36 }
 0x100   : > { %713 = vadd.xlane.f32.xlu1 %v1482_v43 }
 0x102   : > { %v1177_v44 = vpop.f32.mrb[4].mxu0  ;;  %v1201_v45 = vpop.f32.mrb[4].mxu1  ;;  %711 = vadd.xlane.f32.xlu0 %v1478_v37 }
 0x103   : > { %v1178_v46 = vpop.f32.mrb[5].mxu0  ;;  %v1202_v47 = vpop.f32.mrb[5].mxu1 }
 0x104   : > { %v1179_v48 = vadd.f32 %v1178_v46, %v1177_v44  ;;  %v1180_v49 = vpop.f32.mrb[6].mxu0  ;;  %v1485_v50 = vadd.f32 %v1202_v47, %v1201_v45  ;;  %v1204_v51 = vpop.f32.mrb[6].mxu1 }
 0x105   : > { %v1181_v52 = vpop.f32.mrb[7].mxu0  ;;  %v1205_v53 = vpop.f32.mrb[7].mxu1 }
 0x106   : > { %v1488_v54 = vadd.f32 %v1181_v52, %v1180_v49  ;;  %v1490_v55 = vadd.f32 %v1205_v53, %v1204_v51  ;;  %699 = vadd.xlane.f32.xlu1 %v1179_v48  ;;  %697 = vadd.xlane.f32.xlu0 %v1480_v42 }
 0x10a   : > { %v1183_v56 = vpop.f32.mrb[8].mxu0  ;;  %v1207_v57 = vpop.f32.mrb[8].mxu1  ;;  %701 = vadd.xlane.f32.xlu1 %v1488_v54  ;;  %715 = vadd.xlane.f32.xlu0 %v1485_v50 }
 0x10b   : > { %v1184_v58 = vpop.f32.mrb[9].mxu0  ;;  %v1208_v59 = vpop.f32.mrb[9].mxu1 }
 0x10c   : > { %v1493_v60 = vadd.f32 %v1184_v58, %v1183_v56  ;;  %v1186_v61 = vpop.f32.mrb[10].mxu0  ;;  %v1495_v62 = vadd.f32 %v1208_v59, %v1207_v57  ;;  %v1210_v63 = vpop.f32.mrb[10].mxu1 }
 0x10d   : > { %v1187_v0 = vpop.f32.mrb[11].mxu0  ;;  %v1211_v1 = vpop.f32.mrb[11].mxu1 }
 0x10e   : > { %v1499_v2 = vadd.f32 %v1187_v0, %v1186_v61  ;;  %v1501_v3 = vadd.f32 %v1211_v1, %v1210_v63  ;;  %717 = vadd.xlane.f32.xlu1 %v1490_v55  ;;  %703 = vadd.xlane.f32.xlu0 %v1493_v60 }
 0x112   : > { %v1189_v4 = vpop.f32.mrb[12].mxu0  ;;  %v1213_v5 = vpop.f32.mrb[12].mxu1  ;;  %705 = vadd.xlane.f32.xlu1 %v1499_v2  ;;  %719 = vadd.xlane.f32.xlu0 %v1495_v62 }
 0x113   : > { %v1190_v6 = vpop.f32.mrb[13].mxu0  ;;  %v1214_v7 = vpop.f32.mrb[13].mxu1 }
 0x114   : > { %v1505_v8 = vadd.f32 %v1190_v6, %v1189_v4  ;;  %v1192_v9 = vpop.f32.mrb[14].mxu0  ;;  %v1507_v10 = vadd.f32 %v1214_v7, %v1213_v5  ;;  %v1216_v11 = vpop.f32.mrb[14].mxu1 }
 0x115   : > { %v1193_v12 = vpop.f32.mrb[15].mxu0  ;;  %v1217_v13 = vpop.f32.mrb[15].mxu1 }
 0x116   : > { %v1511_v14 = vadd.f32 %v1193_v12, %v1192_v9  ;;  %v1513_v15 = vadd.f32 %v1217_v13, %v1216_v11  ;;  %721 = vadd.xlane.f32.xlu1 %v1501_v3  ;;  %707 = vadd.xlane.f32.xlu0 %v1505_v8 }
 0x11a   : > { %709 = vadd.xlane.f32.xlu1 %v1511_v14  ;;  %723 = vadd.xlane.f32.xlu0 %v1507_v10 }
 0x11e   : > { %725 = vadd.xlane.f32.xlu1 %v1513_v15 }
 0x18b   : > { %v696_v16 = vpop.xlane.xlu0 %695 }
 0x18c   : > { %v728_v17 = vmul.f32 0.0078125, %v696_v16 }
 0x18d   : > { %v714_v19 = vpop.xlane.xlu1 %713 }
 0x18e   : > { %v1520_v18 = vsub.f32 %v1173_v36, %v728_v17  ;;  %v737_v24 = vmul.f32 0.0078125, %v714_v19 }
 0x18f   : > { %v712_v20 = vpop.xlane.xlu0 %711 }
 0x190   : > { %v736_v21 = vmul.f32 0.0078125, %v712_v20  ;;  %v760_v22 = vmul.f32 %v1520_v18, %v1520_v18  ;;  %v1535_v32 = vsub.f32 %v1482_v43, %v737_v24 }
 0x192   : > { %v1525_v23 = vsub.f32 %v1478_v37, %v736_v21  ;;  %776 = vadd.xlane.f32.xlu0 %v760_v22  ;;  %v769_v45 = vmul.f32 %v1535_v32, %v1535_v32 }
 0x193   : > { %v700_v25 = vpop.xlane.xlu1 %699  ;;  %v698_v26 = vpop.xlane.xlu0 %697 }
 0x194   : > { %v730_v27 = vmul.f32 0.0078125, %v700_v25  ;;  %v729_v28 = vmul.f32 0.0078125, %v698_v26  ;;  %v768_v29 = vmul.f32 %v1525_v23, %v1525_v23 }
 0x196   : > { %v1529_v30 = vsub.f32 %v1179_v48, %v730_v27  ;;  %v1532_v31 = vsub.f32 %v1480_v42, %v729_v28  ;;  %792 = vadd.xlane.f32.xlu0 %v768_v29 }
 0x197   : > { %v702_v33 = vpop.xlane.xlu1 %701  ;;  %v716_v34 = vpop.xlane.xlu0 %715 }
 0x198   : > { %v731_v35 = vmul.f32 0.0078125, %v702_v33  ;;  %v738_v36 = vmul.f32 0.0078125, %v716_v34  ;;  %v762_v37 = vmul.f32 %v1529_v30, %v1529_v30  ;;  %v761_v38 = vmul.f32 %v1532_v31, %v1532_v31 }
 0x19a   : > { %v1542_v39 = vsub.f32 %v1485_v50, %v738_v36  ;;  %780 = vadd.xlane.f32.xlu0 %v762_v37  ;;  %778 = vadd.xlane.f32.xlu1 %v761_v38  ;;  %v1545_v40 = vsub.f32 %v1488_v54, %v731_v35  ;;  %v1607_v37 = vld [vmem:[%s1721_s3] ss:$0 sm:$0xff] }
 0x19b   : > { %v718_v41 = vpop.xlane.xlu1 %717  ;;  %v704_v42 = vpop.xlane.xlu0 %703 }
 0x19c   : > { %v739_v43 = vmul.f32 0.0078125, %v718_v41  ;;  %v732_v44 = vmul.f32 0.0078125, %v704_v42  ;;  %v770_v46 = vmul.f32 %v1542_v39, %v1542_v39  ;;  %v763_v50 = vmul.f32 %v1545_v40, %v1545_v40  ;;  %v1610_v41 = vld [vmem:[%s1602_s17] sm:$0xff]  }
 0x19e   : > { %v1552_v47 = vsub.f32 %v1493_v60, %v732_v44  ;;  %794 = vadd.xlane.f32.xlu1 %v769_v45  ;;  %796 = vadd.xlane.f32.xlu0 %v770_v46  ;;  %v1557_v51 = vsub.f32 %v1490_v55, %v739_v43 }
 0x19f   : > { %v706_v48 = vpop.xlane.xlu1 %705  ;;  %v720_v49 = vpop.xlane.xlu0 %719 }
 0x1a0   : > { %v733_v52 = vmul.f32 0.0078125, %v706_v48  ;;  %v740_v53 = vmul.f32 0.0078125, %v720_v49  ;;  %v764_v54 = vmul.f32 %v1552_v47, %v1552_v47  ;;  %v771_v55 = vmul.f32 %v1557_v51, %v1557_v51  ;;  %v1616_v48 = vld [vmem:[%s1722_s4] ss:$0 sm:$0xff] }
 0x1a2   : > { %v1562_v56 = vsub.f32 %v1495_v62, %v740_v53  ;;  %782 = vadd.xlane.f32.xlu1 %v763_v50  ;;  %784 = vadd.xlane.f32.xlu0 %v764_v54  ;;  %v1565_v57 = vsub.f32 %v1499_v2, %v733_v52  ;;  %v1118_v52 = vunpack.c.l.bf16 %v1610_v41 }
 0x1a3   : > { %v722_v58 = vpop.xlane.xlu1 %721  ;;  %v708_v59 = vpop.xlane.xlu0 %707 }
 0x1a4   : > { %v741_v60 = vmul.f32 0.0078125, %v722_v58  ;;  %v734_v61 = vmul.f32 0.0078125, %v708_v59  ;;  %v772_v63 = vmul.f32 %v1562_v56, %v1562_v56  ;;  %v765_v2 = vmul.f32 %v1565_v57, %v1565_v57  ;;  %v1621_v58 = vld [vmem:[%s1602_s17 + $0x20] sm:$0xff]  }
 0x1a6   : > { %v1572_v0 = vsub.f32 %v1505_v8, %v734_v61  ;;  %798 = vadd.xlane.f32.xlu1 %v771_v55  ;;  %800 = vadd.xlane.f32.xlu0 %v772_v63  ;;  %v1577_v4 = vsub.f32 %v1501_v3, %v741_v60 }
 0x1a7   : > { %v710_v62 = vpop.xlane.xlu1 %709  ;;  %v724_v1 = vpop.xlane.xlu0 %723 }
 0x1a8   : > { %v735_v5 = vmul.f32 0.0078125, %v710_v62  ;;  %v742_v6 = vmul.f32 0.0078125, %v724_v1  ;;  %v766_v7 = vmul.f32 %v1572_v0, %v1572_v0  ;;  %v773_v13 = vmul.f32 %v1577_v4, %v1577_v4 }
 0x1aa   : > { %v1582_v9 = vsub.f32 %v1507_v10, %v742_v6  ;;  %786 = vadd.xlane.f32.xlu1 %v765_v2  ;;  %788 = vadd.xlane.f32.xlu0 %v766_v7  ;;  %v1585_v11 = vsub.f32 %v1511_v14, %v735_v5  ;;  %v1134_v5 = vunpack.c.l.bf16 %v1621_v58 }
 0x1ab   : > { %v726_v8 = vpop.xlane.xlu1 %725 }
 0x1ac   : > { %v743_v12 = vmul.f32 0.0078125, %v726_v8  ;;  %v774_v3 = vmul.f32 %v1582_v9, %v1582_v9  ;;  %v767_v10 = vmul.f32 %v1585_v11, %v1585_v11 }
 0x1ae   : > { %802 = vadd.xlane.f32.xlu1 %v773_v13  ;;  %804 = vadd.xlane.f32.xlu0 %v774_v3  ;;  %v1592_v16 = vsub.f32 %v1513_v15, %v743_v12 }
 0x1b0   : > { %v775_v14 = vmul.f32 %v1592_v16, %v1592_v16 }
 0x1b2   : > { %790 = vadd.xlane.f32.xlu1 %v767_v10  ;;  %v1638_v10 = vld [vmem:[%s1602_s17 + $0x8] sm:$0xff]  }
 0x1b6   : > { %806 = vadd.xlane.f32.xlu1 %v775_v14 }
 0x21f   : > { %v777_v17 = vpop.xlane.xlu0 %776 }
 0x220   : > { %v808_v19 = vmul.f32 0.0078125, %v777_v17 }
 0x222   : > { %v824_v20 = vadd.f32 1e-05, %v808_v19 }
 0x223   : > { %v793_v21 = vpop.xlane.xlu0 %792 }
 0x224   : > { %1300 = vrsqrt.f32 %v824_v20  ;;  %v816_v22 = vmul.f32 0.0078125, %v793_v21 }
 0x226   : > { %v832_v24 = vadd.f32 1e-05, %v816_v22 }
 0x227   : > { %v779_v25 = vpop.xlane.xlu1 %778  ;;  %v781_v26 = vpop.xlane.xlu0 %780 }
 0x228   : > { %1302 = vrsqrt.f32 %v832_v24  ;;  %v809_v15 = vmul.f32 0.0078125, %v779_v25  ;;  %v810_v27 = vmul.f32 0.0078125, %v781_v26  ;;  %v1119_v24 = vunpack.c.h.bf16 %v1610_v41 }
 0x22a   : > { %v825_v28 = vadd.f32 1e-05, %v809_v15  ;;  %v826_v29 = vadd.f32 1e-05, %v810_v27 }
 0x22b   : > { %v795_v33 = vpop.xlane.xlu1 %794  ;;  %v797_v34 = vpop.xlane.xlu0 %796 }
 0x22c   : > { %1304 = vrsqrt.f32 %v825_v28  ;;  %v817_v35 = vmul.f32 0.0078125, %v795_v33  ;;  %v818_v36 = vmul.f32 0.0078125, %v797_v34  ;;  %v1135_v33 = vunpack.c.h.bf16 %v1621_v58 }
 0x22d   : > { %1306 = vrsqrt.f32 %v826_v29 }
 0x22e   : > { %v1301_v38 = vpop.eup %1300  ;;  %v833_v42 = vadd.f32 1e-05, %v817_v35  ;;  %v834_v43 = vadd.f32 1e-05, %v818_v36  ;;  %v1650_v35 = vld [vmem:[%s1602_s17 + $0x28] sm:$0xff]  }
 0x22f   : > { %v856_v44 = vmul.f32 %v1301_v38, %v1520_v18  ;;  %v783_v45 = vpop.xlane.xlu1 %782  ;;  %v785_v46 = vpop.xlane.xlu0 %784 }
 0x230   : > { %1308 = vrsqrt.f32 %v833_v42  ;;  %v811_v49 = vmul.f32 0.0078125, %v783_v45  ;;  %v812_v50 = vmul.f32 0.0078125, %v785_v46 }
 0x231   : > { %v879_v53 = vmul.f32 %v1607_v37, %v856_v44  ;;  %1310 = vrsqrt.f32 %v834_v43 }
 0x232   : > { %v1303_v54 = vpop.eup %1302  ;;  %v827_v18 = vadd.f32 1e-05, %v811_v49  ;;  %v828_v59 = vadd.f32 1e-05, %v812_v50  ;;  %v1138_v50 = vunpack.c.l.bf16 %v1650_v35 }
 0x233   : > { %v902_v60 = vadd.f32 %v1616_v48, %v879_v53  ;;  %v864_v61 = vmul.f32 %v1303_v54, %v1525_v23  ;;  %v799_v55 = vpop.xlane.xlu1 %798  ;;  %v801_v63 = vpop.xlane.xlu0 %800 }
 0x234   : > { %1312 = vrsqrt.f32 %v827_v18  ;;  %v819_v62 = vmul.f32 0.0078125, %v799_v55  ;;  %v820_v1 = vmul.f32 0.0078125, %v801_v63  ;;  %v1149_v18 = vld [vmem:[%s1602_s17 + $0x10] sm:$0xff]  }
 0x235   : > { %v950_v2 = vadd.f32 %v1118_v52, %v902_v60  ;;  %v887_v6 = vmul.f32 %v1607_v37, %v864_v61  ;;  %1314 = vrsqrt.f32 %v828_v59 }
 0x236   : > { %v1305_v23 = vpop.eup %1304  ;;  %v835_v7 = vadd.f32 1e-05, %v819_v62  ;;  %v836_v8 = vadd.f32 1e-05, %v820_v1  ;;  %v1123_v1 = vunpack.c.h.bf16 %v1638_v10 }
 0x237   : > { %v1307_v12 = vpop.eup %1306  ;;  %966 = vst [vmem:[%s1630_s28] sm:$0xff] %v950_v2  ;;  %v910_v13 = vadd.f32 %v1616_v48, %v887_v6  ;;  %v857_v3 = vmul.f32 %v1305_v23, %v1532_v31  ;;  %v787_v14 = vpop.xlane.xlu1 %786  ;;  %v1122_v31 = vunpack.c.l.bf16 %v1638_v10  ;;  %v1126_v6 = vunpack.c.l.bf16 %v1149_v18 }
 0x238   : > { %v789_v17 = vpop.xlane.xlu0 %788  ;;  %v858_v19 = vmul.f32 %v1307_v12, %v1529_v30  ;;  %1316 = vrsqrt.f32 %v835_v7  ;;  %v813_v20 = vmul.f32 0.0078125, %v787_v14 }
 0x239   : > { %v814_v21 = vmul.f32 0.0078125, %v789_v17  ;;  %v958_v22 = vadd.f32 %v1134_v5, %v910_v13  ;;  %v880_v25 = vmul.f32 %v1607_v37, %v857_v3  ;;  %1318 = vrsqrt.f32 %v836_v8  ;;  %v1153_v13 = vld [vmem:[%s1602_s17 + $0x30] sm:$0xff]  }
 0x23a   : > { %v1309_v26 = vpop.eup %1308  ;;  %v881_v15 = vmul.f32 %v1607_v37, %v858_v19  ;;  %v829_v27 = vadd.f32 1e-05, %v813_v20  ;;  %v1139_v20 = vunpack.c.h.bf16 %v1650_v35 }
 0x23b   : > { %v830_v28 = vadd.f32 1e-05, %v814_v21  ;;  %v1311_v29 = vpop.eup %1310  ;;  %974 = vst [vmem:[%s1630_s28 + $0x40] sm:$0xff] %v958_v22  ;;  %v903_v30 = vadd.f32 %v1616_v48, %v880_v25  ;;  %v865_v34 = vmul.f32 %v1309_v26, %v1535_v32  ;;  %v803_v36 = vpop.xlane.xlu1 %802 }
 0x23c   : > { %v805_v38 = vpop.xlane.xlu0 %804  ;;  %v904_v41 = vadd.f32 %v1616_v48, %v881_v15  ;;  %v866_v42 = vmul.f32 %v1311_v29, %v1542_v39  ;;  %1320 = vrsqrt.f32 %v829_v27  ;;  %v821_v43 = vmul.f32 0.0078125, %v803_v36  ;;  %v1150_v27 = vld [vmem:[%s1602_s17 + $0x18] sm:$0xff]  }
 0x23d   : > { %v951_v44 = vadd.f32 %v1119_v24, %v903_v30  ;;  %v888_v45 = vmul.f32 %v1607_v37, %v865_v34  ;;  %1322 = vrsqrt.f32 %v830_v28  ;;  %v822_v46 = vmul.f32 0.0078125, %v805_v38 }
 0x23e   : > { %v1313_v49 = vpop.eup %1312  ;;  %v952_v32 = vadd.f32 %v1122_v31, %v904_v41  ;;  %v889_v52 = vmul.f32 %v1607_v37, %v866_v42  ;;  %v837_v53 = vadd.f32 1e-05, %v821_v43  ;;  %v1130_v38 = vunpack.c.l.bf16 %v1150_v27 }
 0x23f   : > { %v1315_v54 = vpop.eup %1314  ;;  %967 = vst [vmem:[%s1630_s28 + $0x8] sm:$0xff] %v951_v44  ;;  %v911_v39 = vadd.f32 %v1616_v48, %v888_v45  ;;  %v859_v58 = vmul.f32 %v1313_v49, %v1545_v40  ;;  %v838_v59 = vadd.f32 1e-05, %v822_v46  ;;  %v791_v60 = vpop.xlane.xlu1 %790  ;;  %v1154_v44 = vld [vmem:[%s1602_s17 + $0x38] sm:$0xff]   ;;  %v1143_v49 = vunpack.c.h.bf16 %v1153_v13 }
 0x240   : > { %968 = vst [vmem:[%s1630_s28 + $0x10] sm:$0xff] %v952_v32  ;;  %v912_v61 = vadd.f32 %v1616_v48, %v889_v52  ;;  %v860_v55 = vmul.f32 %v1315_v54, %v1552_v47  ;;  %1324 = vrsqrt.f32 %v837_v53  ;;  %v815_v63 = vmul.f32 0.0078125, %v791_v60 }
 0x241   : > { %v959_v62 = vadd.f32 %v1135_v33, %v911_v39  ;;  %v882_v2 = vmul.f32 %v1607_v37, %v859_v58  ;;  %1326 = vrsqrt.f32 %v838_v59  ;;  %v1127_v33 = vunpack.c.h.bf16 %v1149_v18 }
 0x242   : > { %v1317_v40 = vpop.eup %1316  ;;  %v960_v5 = vadd.f32 %v1138_v50, %v912_v61  ;;  %v883_v23 = vmul.f32 %v1607_v37, %v860_v55  ;;  %v831_v7 = vadd.f32 1e-05, %v815_v63  ;;  %v1146_v53 = vunpack.c.l.bf16 %v1154_v44 }
 0x243   : > { %v1319_v8 = vpop.eup %1318  ;;  %975 = vst [vmem:[%s1630_s28 + $0x48] sm:$0xff] %v959_v62  ;;  %v905_v47 = vadd.f32 %v1616_v48, %v882_v2  ;;  %v867_v12 = vmul.f32 %v1317_v40, %v1557_v51  ;;  %v807_v3 = vpop.xlane.xlu1 %806  ;;  %v1142_v51 = vunpack.c.l.bf16 %v1153_v13  ;;  %v1131_v18 = vunpack.c.h.bf16 %v1150_v27 }
 0x244   : > { %976 = vst [vmem:[%s1630_s28 + $0x50] sm:$0xff] %v960_v5  ;;  %v906_v10 = vadd.f32 %v1616_v48, %v883_v23  ;;  %v868_v14 = vmul.f32 %v1319_v8, %v1562_v56  ;;  %1328 = vrsqrt.f32 %v831_v7  ;;  %v823_v17 = vmul.f32 0.0078125, %v807_v3 }
 0x245   : > { %v953_v19 = vadd.f32 %v1123_v1, %v905_v47  ;;  %v890_v21 = vmul.f32 %v1607_v37, %v867_v12  ;;  %v1147_v1 = vunpack.c.h.bf16 %v1154_v44 }
 0x246   : > { %v1321_v22 = vpop.eup %1320  ;;  %v954_v24 = vadd.f32 %v1126_v6, %v906_v10  ;;  %v891_v25 = vmul.f32 %v1607_v37, %v868_v14  ;;  %v839_v26 = vadd.f32 1e-05, %v823_v17 }
 0x247   : > { %v1323_v31 = vpop.eup %1322  ;;  %969 = vst [vmem:[%s1630_s28 + $0x18] sm:$0xff] %v953_v19  ;;  %v913_v15 = vadd.f32 %v1616_v48, %v890_v21  ;;  %v861_v56 = vmul.f32 %v1321_v22, %v1565_v57 }
 0x248   : > { %970 = vst [vmem:[%s1630_s28 + $0x20] sm:$0xff] %v954_v24  ;;  %v914_v28 = vadd.f32 %v1616_v48, %v891_v25  ;;  %v862_v29 = vmul.f32 %v1323_v31, %v1572_v0  ;;  %1330 = vrsqrt.f32 %v839_v26 }
 0x249   : > { %v961_v30 = vadd.f32 %v1139_v20, %v913_v15  ;;  %v884_v34 = vmul.f32 %v1607_v37, %v861_v56 }
 0x24a   : > { %v1325_v35 = vpop.eup %1324  ;;  %v962_v36 = vadd.f32 %v1142_v51, %v914_v28  ;;  %v885_v41 = vmul.f32 %v1607_v37, %v862_v29 }
 0x24b   : > { %v1327_v57 = vpop.eup %1326  ;;  %977 = vst [vmem:[%s1630_s28 + $0x58] sm:$0xff] %v961_v30  ;;  %v907_v42 = vadd.f32 %v1616_v48, %v884_v34  ;;  %v869_v43 = vmul.f32 %v1325_v35, %v1577_v4 }
 0x24c   : > { %978 = vst [vmem:[%s1630_s28 + $0x60] sm:$0xff] %v962_v36  ;;  %v908_v0 = vadd.f32 %v1616_v48, %v885_v41  ;;  %v870_v45 = vmul.f32 %v1327_v57, %v1582_v9 }
 0x24d   : > { %v955_v46 = vadd.f32 %v1127_v33, %v907_v42  ;;  %v892_v32 = vmul.f32 %v1607_v37, %v869_v43 }
 0x24e   : > { %v1329_v50 = vpop.eup %1328  ;;  %v956_v52 = vadd.f32 %v1130_v38, %v908_v0  ;;  %v893_v54 = vmul.f32 %v1607_v37, %v870_v45 }
 0x24f   : > { %971 = vst [vmem:[%s1630_s28 + $0x28] sm:$0xff] %v955_v46  ;;  %v915_v4 = vadd.f32 %v1616_v48, %v892_v32  ;;  %v863_v39 = vmul.f32 %v1329_v50, %v1585_v11 }
 0x250   : > { %972 = vst [vmem:[%s1630_s28 + $0x30] sm:$0xff] %v956_v52  ;;  %v916_v9 = vadd.f32 %v1616_v48, %v893_v54 }
 0x251   : > { %v963_v58 = vadd.f32 %v1143_v49, %v915_v4  ;;  %v886_v59 = vmul.f32 %v1607_v37, %v863_v39 }
 0x252   : > { %v1331_v60 = vpop.eup %1330  ;;  %v964_v61 = vadd.f32 %v1146_v53, %v916_v9 }
 0x253   : > { %979 = vst [vmem:[%s1630_s28 + $0x68] sm:$0xff] %v963_v58  ;;  %v909_v55 = vadd.f32 %v1616_v48, %v886_v59  ;;  %v871_v63 = vmul.f32 %v1331_v60, %v1592_v16 }
 0x254   : > { %980 = vst [vmem:[%s1630_s28 + $0x70] sm:$0xff] %v964_v61 }
 0x255   : > { %v957_v62 = vadd.f32 %v1131_v18, %v909_v55  ;;  %v894_v11 = vmul.f32 %v1607_v37, %v871_v63 }
 0x257   : > { %973 = vst [vmem:[%s1630_s28 + $0x38] sm:$0xff] %v957_v62  ;;  %v917_v2 = vadd.f32 %v1616_v48, %v894_v11 }
 0x259   : > { %v965_v40 = vadd.f32 %v1147_v1, %v917_v2 }
 0x25b   : > { %981 = vst [vmem:[%s1630_s28 + $0x78] sm:$0xff] %v965_v40 }
 0x25c PF: > { %s15_s20 = sadd.s32 1, %s1354_s20   ;;  %s1724_s18 = smov %s1350_s19 }
 0x25d   : > { %p12_p5 = scmp.ge.s32.totalorder %s15_s20, 4   ;;  %s1725_s19 = smov %s1727_s21 }
 0x25f   :  { %14 = sbr.rel (!%p12_p5) target bundleno = 2 (0x2), region = 82 }

</bundles_post_ra>
